<compile_context>
chip_gen: v7x
topology: tpu7x:2x2x1
jax: 0.10.0
libtpu: 0.0.40
codegen_flags: <defaults>
</compile_context>

<pallas_src>
import jax
import jax.numpy as jnp
from jax.experimental import pallas as pl
from jax.experimental.pallas import tpu as pltpu


def _round_up(x, m):
    return ((x + m - 1) // m) * m


# ---------------------------------------------------------------------------
# Kernel
# ---------------------------------------------------------------------------
def _icm_kernel(obs_ref, act_ref, nobs_ref,
                ew1, ew2, fw1a, fw1b, fw2, bw1a, bw1b, bw2,
                eb1, eb2, fb1, fb2, bb1, bb2,
                err_ref):
    f32 = jnp.float32
    bf16 = jnp.bfloat16
    tb = obs_ref.shape[0]  # batch tile (static, multiple of 8)

    # ---- encoder once on batch-stacked [obs ; next_obs] (sublane concat) ----
    x = jnp.concatenate([obs_ref[...], nobs_ref[...]], axis=0).astype(bf16)
    h = jnp.maximum(
        jnp.dot(x, ew1[...], preferred_element_type=f32) + eb1[...], 0.0)
    e = jnp.dot(h.astype(bf16), ew2[...], preferred_element_type=f32) + eb2[...]

    e_obs_b = e[:tb].astype(bf16)     # tile-aligned sublane split
    e_nobs = e[tb:]                   # kept in f32 for the error math

    act = act_ref[...]

    # ---- forward_net: split-weight matmuls replace the lane-axis concat ----
    hf = jnp.maximum(
        jnp.dot(e_obs_b, fw1a[...], preferred_element_type=f32)
        + jnp.dot(act.astype(bf16), fw1b[...], preferred_element_type=f32)
        + fb1[...], 0.0)
    nobs_hat = jnp.dot(hf.astype(bf16), fw2[...],
                       preferred_element_type=f32) + fb2[...]

    # ---- backward_net (Tanh head): split-weight matmuls replace the concat ----
    hb = jnp.maximum(
        jnp.dot(e_obs_b, bw1a[...], preferred_element_type=f32)
        + jnp.dot(e_nobs.astype(bf16), bw1b[...], preferred_element_type=f32)
        + bb1[...], 0.0)
    act_hat = jnp.tanh(jnp.dot(hb.astype(bf16), bw2[...],
                               preferred_element_type=f32) + bb2[...])

    # ---- L2 errors over the (zero-padded) feature axis; padding adds exact 0 ----
    fd = e_nobs - nobs_hat
    bd = act - act_hat
    err_ref[:, 0:1] = jnp.sqrt(jnp.sum(fd * fd, axis=-1, keepdims=True))
    err_ref[:, 1:2] = jnp.sqrt(jnp.sum(bd * bd, axis=-1, keepdims=True))


# ---------------------------------------------------------------------------
# Parameter preparation: per-layer tile-aligned padding, bf16 weights, f32 biases.
# ---------------------------------------------------------------------------
def prepare_icm_params(params, dims, weight_dtype=jnp.bfloat16):
    obs_dim, action_dim, hidden_dim, rep_dim = dims
    obs_p = _round_up(obs_dim, 128)
    act_p = _round_up(action_dim, 128)
    hid_p = _round_up(hidden_dim, 128)
    rep_p = _round_up(rep_dim, 128)

    (enc_w1, enc_b1, enc_w2, enc_b2,
     fwd_w1, fwd_b1, fwd_w2, fwd_b2,
     bwd_w1, bwd_b1, bwd_w2, bwd_b2) = params

    def pw(a, kp, np_):
        k, n = a.shape
        return jnp.pad(a, ((0, kp - k), (0, np_ - n))).astype(weight_dtype)

    def pb(a, np_):
        a = a.reshape(1, -1)
        return jnp.pad(a, ((0, 0), (0, np_ - a.shape[1]))).astype(jnp.float32)

    # First layers of forward/backward nets pre-split at their concat boundary.
    weights = (
        pw(enc_w1, obs_p, hid_p),
        pw(enc_w2, hid_p, rep_p),
        pw(fwd_w1[:rep_dim], rep_p, hid_p),
        pw(fwd_w1[rep_dim:], act_p, hid_p),
        pw(fwd_w2, hid_p, rep_p),
        pw(bwd_w1[:rep_dim], rep_p, hid_p),
        pw(bwd_w1[rep_dim:], rep_p, hid_p),
        pw(bwd_w2, hid_p, act_p),
    )
    biases = (
        pb(enc_b1, hid_p), pb(enc_b2, rep_p),
        pb(fwd_b1, hid_p), pb(fwd_b2, rep_p),
        pb(bwd_b1, hid_p), pb(bwd_b2, act_p),
    )
    padded_dims = (obs_p, act_p, hid_p, rep_p)
    return weights, biases, padded_dims


# ---------------------------------------------------------------------------
# Wrapper
# ---------------------------------------------------------------------------
def icm_forward(obs, action, next_obs, weights, biases, dims, padded_dims,
                max_tile_b=512, single_buffer_params=True):
    obs_dim, action_dim, hidden_dim, rep_dim = dims
    obs_p, act_p, hid_p, rep_p = padded_dims
    B = obs.shape[0]

    # Batch tile: multiple of 8, >=2 grid steps when B allows (v7x megacore).
    tb = max(8, min(max_tile_b, _round_up(pl.cdiv(B, 2), 8)))
    B_pad = _round_up(B, tb)
    grid = (B_pad // tb,)

    def pad2d(a, dp):
        return jnp.pad(a.astype(jnp.float32),
                       ((0, B_pad - B), (0, dp - a.shape[1])))

    obs_in = pad2d(obs, obs_p)
    act_in = pad2d(action, act_p)
    nobs_in = pad2d(next_obs, obs_p)

    def data_spec(d):
        return pl.BlockSpec((tb, d), lambda i: (i, 0))

    def resident_spec(arr, single):
        mode = pl.Buffered(1) if single else None
        return pl.BlockSpec(arr.shape, lambda i: (0, 0), pipeline_mode=mode)

    # --- VMEM budget: resident params + double-buffered data tiles + live acts ---
    param_bytes = sum(int(a.size) * a.dtype.itemsize for a in (*weights, *biases))
    data_tile_bytes = 4 * (2 * tb * obs_p + tb * act_p + tb * 2)
    act_bytes = 4 * tb * (2 * obs_p + 4 * hid_p + 4 * rep_p + 2 * act_p)
    vmem_limit = (param_bytes * (1 if single_buffer_params else 2)
                  + 2 * data_tile_bytes + 2 * act_bytes + (8 << 20))
    vmem_limit = int(min(max(vmem_limit, 32 << 20), 64 << 20))

    args = (obs_in, act_in, nobs_in, *weights, *biases)

    def build(single):
        return pl.pallas_call(
            _icm_kernel,
            out_shape=jax.ShapeDtypeStruct((B_pad, 2), jnp.float32),
            grid=grid,
            in_specs=([data_spec(obs_p), data_spec(act_p), data_spec(obs_p)]
                      + [resident_spec(w, single) for w in weights]
                      + [resident_spec(b, single) for b in biases]),
            out_specs=pl.BlockSpec((tb, 2), lambda i: (i, 0)),
            compiler_params=pltpu.CompilerParams(
                dimension_semantics=("parallel",),
                vmem_limit_bytes=vmem_limit),
        )

    if single_buffer_params:
        try:
            err = build(True)(*args)
        except Exception:
            # Fallback if this JAX build rejects pipeline_mode=pl.Buffered(1).
            err = build(False)(*args)
    else:
        err = build(False)(*args)

    return err[:B, 0:1], err[:B, 1:2]  # (forward_error [B,1], backward_error [B,1])


# ---------------------------------------------------------------------------
# Deterministic synthetic parameter init (utils.weight_init not available).
# ---------------------------------------------------------------------------
def init_icm_params(key, obs_dim, action_dim, hidden_dim, apt_rep_dim):
    # TODO(synk): original module uses utils.weight_init; synthetic init used here.
    def linear(k, fan_in, fan_out):
        kw, kb = jax.random.split(k)
        scale = 1.0 / jnp.sqrt(jnp.float32(fan_in))
        w = jax.random.normal(kw, (fan_in, fan_out), jnp.float32) * scale
        b = jax.random.normal(kb, (1, fan_out), jnp.float32) * 0.01
        return w, b

    ks = jax.random.split(key, 6)
    enc_w1, enc_b1 = linear(ks[0], obs_dim, hidden_dim)
    enc_w2, enc_b2 = linear(ks[1], hidden_dim, apt_rep_dim)
    fwd_w1, fwd_b1 = linear(ks[2], apt_rep_dim + action_dim, hidden_dim)
    fwd_w2, fwd_b2 = linear(ks[3], hidden_dim, apt_rep_dim)
    bwd_w1, bwd_b1 = linear(ks[4], 2 * apt_rep_dim, hidden_dim)
    bwd_w2, bwd_b2 = linear(ks[5], hidden_dim, action_dim)
    return (enc_w1, enc_b1, enc_w2, enc_b2,
            fwd_w1, fwd_b1, fwd_w2, fwd_b2,
            bwd_w1, bwd_b1, bwd_w2, bwd_b2)


def icm_forward_ref(obs, action, next_obs, params):
    """Pure-JAX f32 reference (mirrors the PyTorch module)."""
    (enc_w1, enc_b1, enc_w2, enc_b2,
     fwd_w1, fwd_b1, fwd_w2, fwd_b2,
     bwd_w1, bwd_b1, bwd_w2, bwd_b2) = params

    def mlp(x, w1, b1, w2, b2):
        return jnp.maximum(x @ w1 + b1, 0.0) @ w2 + b2

    eo = mlp(obs, enc_w1, enc_b1, enc_w2, enc_b2)
    en = mlp(next_obs, enc_w1, enc_b1, enc_w2, enc_b2)
    nh = mlp(jnp.concatenate([eo, action], -1), fwd_w1, fwd_b1, fwd_w2, fwd_b2)
    ah = jnp.tanh(mlp(jnp.concatenate([eo, en], -1), bwd_w1, bwd_b1, bwd_w2, bwd_b2))
    fe = jnp.linalg.norm(en - nh, axis=-1, keepdims=True)
    be = jnp.linalg.norm(action - ah, axis=-1, keepdims=True)
    return fe, be


if __name__ == "__main__":
    B, obs_dim, action_dim, hidden_dim, apt_rep_dim = 8, 16, 4, 32, 8
    dims = (obs_dim, action_dim, hidden_dim, apt_rep_dim)

    key = jax.random.PRNGKey(0)
    k_obs, k_act, k_nobs, k_params = jax.random.split(key, 4)

    obs = jax.random.normal(k_obs, (B, obs_dim), jnp.float32)
    action = jnp.tanh(jax.random.normal(k_act, (B, action_dim), jnp.float32))
    next_obs = jax.random.normal(k_nobs, (B, obs_dim), jnp.float32)

    params = init_icm_params(k_params, obs_dim, action_dim, hidden_dim, apt_rep_dim)
    weights, biases, padded_dims = prepare_icm_params(params, dims)

    fwd_err, bwd_err = jax.block_until_ready(
        icm_forward(obs, action, next_obs, weights, biases, dims, padded_dims))

    fwd_ref, bwd_ref = icm_forward_ref(obs, action, next_obs, params)
    assert fwd_err.shape == (B, 1) and bwd_err.shape == (B, 1)
    # bf16 MXU operands -> looser tolerance than the pure-f32 reference.
    assert jnp.allclose(fwd_err, fwd_ref, atol=5e-2, rtol=5e-2)
    assert jnp.allclose(bwd_err, bwd_ref, atol=5e-2, rtol=5e-2)

    print("KERNEL_OK")
</pallas_src>

<mosaic_0001>
module attributes {stable_mosaic.version = 11 : i64} {
  func.func @_icm_kernel(%arg0: i32, %arg1: memref<8x128xf32, #tpu.memory_space<vmem>>, %arg2: memref<8x128xf32, #tpu.memory_space<vmem>>, %arg3: memref<8x128xf32, #tpu.memory_space<vmem>>, %arg4: memref<128x128xbf16, #tpu.memory_space<vmem>>, %arg5: memref<128x128xbf16, #tpu.memory_space<vmem>>, %arg6: memref<128x128xbf16, #tpu.memory_space<vmem>>, %arg7: memref<128x128xbf16, #tpu.memory_space<vmem>>, %arg8: memref<128x128xbf16, #tpu.memory_space<vmem>>, %arg9: memref<128x128xbf16, #tpu.memory_space<vmem>>, %arg10: memref<128x128xbf16, #tpu.memory_space<vmem>>, %arg11: memref<128x128xbf16, #tpu.memory_space<vmem>>, %arg12: memref<1x128xf32, #tpu.memory_space<vmem>>, %arg13: memref<1x128xf32, #tpu.memory_space<vmem>>, %arg14: memref<1x128xf32, #tpu.memory_space<vmem>>, %arg15: memref<1x128xf32, #tpu.memory_space<vmem>>, %arg16: memref<1x128xf32, #tpu.memory_space<vmem>>, %arg17: memref<1x128xf32, #tpu.memory_space<vmem>>, %arg18: memref<8x2xf32, #tpu.memory_space<vmem>>) attributes {dimension_semantics = [#tpu.dimension_semantics<parallel>], iteration_bounds = array<i64: 1>, scalar_prefetch = 0 : i64, scratch_operands = 0 : i64, tpu.core_type = #tpu.core_type<tc>, window_params = [{transform_indices = @transform_0, window_bounds = array<i64: 8, 128>}, {transform_indices = @transform_1, window_bounds = array<i64: 8, 128>}, {transform_indices = @transform_2, window_bounds = array<i64: 8, 128>}, {pipeline_mode = #tpu.pipeline_mode<synchronous>, transform_indices = @transform_3, window_bounds = array<i64: 128, 128>}, {pipeline_mode = #tpu.pipeline_mode<synchronous>, transform_indices = @transform_4, window_bounds = array<i64: 128, 128>}, {pipeline_mode = #tpu.pipeline_mode<synchronous>, transform_indices = @transform_5, window_bounds = array<i64: 128, 128>}, {pipeline_mode = #tpu.pipeline_mode<synchronous>, transform_indices = @transform_6, window_bounds = array<i64: 128, 128>}, {pipeline_mode = #tpu.pipeline_mode<synchronous>, transform_indices = @transform_7, window_bounds = array<i64: 128, 128>}, {pipeline_mode = #tpu.pipeline_mode<synchronous>, transform_indices = @transform_8, window_bounds = array<i64: 128, 128>}, {pipeline_mode = #tpu.pipeline_mode<synchronous>, transform_indices = @transform_9, window_bounds = array<i64: 128, 128>}, {pipeline_mode = #tpu.pipeline_mode<synchronous>, transform_indices = @transform_10, window_bounds = array<i64: 128, 128>}, {pipeline_mode = #tpu.pipeline_mode<synchronous>, transform_indices = @transform_11, window_bounds = array<i64: 1, 128>}, {pipeline_mode = #tpu.pipeline_mode<synchronous>, transform_indices = @transform_12, window_bounds = array<i64: 1, 128>}, {pipeline_mode = #tpu.pipeline_mode<synchronous>, transform_indices = @transform_13, window_bounds = array<i64: 1, 128>}, {pipeline_mode = #tpu.pipeline_mode<synchronous>, transform_indices = @transform_14, window_bounds = array<i64: 1, 128>}, {pipeline_mode = #tpu.pipeline_mode<synchronous>, transform_indices = @transform_15, window_bounds = array<i64: 1, 128>}, {pipeline_mode = #tpu.pipeline_mode<synchronous>, transform_indices = @transform_16, window_bounds = array<i64: 1, 128>}, {transform_indices = @transform_17, window_bounds = array<i64: 8, 2>}]} {
    %c0 = arith.constant 0 : index
    %c0_0 = arith.constant 0 : index
    %0 = vector.load %arg1[%c0, %c0_0] : memref<8x128xf32, #tpu.memory_space<vmem>>, vector<8x128xf32>
    %c0_1 = arith.constant 0 : index
    %c0_2 = arith.constant 0 : index
    %1 = vector.load %arg3[%c0_1, %c0_2] : memref<8x128xf32, #tpu.memory_space<vmem>>, vector<8x128xf32>
    %2 = tpu.concatenate %0, %1 in 0 : vector<8x128xf32>, vector<8x128xf32> -> vector<16x128xf32>
    %3 = arith.truncf %2 : vector<16x128xf32> to vector<16x128xbf16>
    %c0_3 = arith.constant 0 : index
    %c0_4 = arith.constant 0 : index
    %4 = vector.load %arg4[%c0_3, %c0_4] : memref<128x128xbf16, #tpu.memory_space<vmem>>, vector<128x128xbf16>
    %cst = arith.constant dense<0.000000e+00> : vector<16x128xf32>
    %5 = tpu.matmul %3, %4, %cst {dimension_numbers = #tpu.dot_dimension_numbers<[1], [0], [0], [1], [0, 0, 1, 1], [], []>} : vector<16x128xbf16>, vector<128x128xbf16>, vector<16x128xf32> -> vector<16x128xf32>
    %c0_5 = arith.constant 0 : index
    %c0_6 = arith.constant 0 : index
    %6 = vector.load %arg12[%c0_5, %c0_6] : memref<1x128xf32, #tpu.memory_space<vmem>>, vector<1x128xf32>
    %7 = vector.broadcast %6 : vector<1x128xf32> to vector<16x128xf32>
    %8 = arith.addf %5, %7 : vector<16x128xf32>
    %cst_7 = arith.constant 0.000000e+00 : f32
    %9 = vector.broadcast %cst_7 : f32 to vector<16x128xf32>
    %10 = arith.maximumf %8, %9 : vector<16x128xf32>
    %11 = arith.truncf %10 : vector<16x128xf32> to vector<16x128xbf16>
    %c0_8 = arith.constant 0 : index
    %c0_9 = arith.constant 0 : index
    %12 = vector.load %arg5[%c0_8, %c0_9] : memref<128x128xbf16, #tpu.memory_space<vmem>>, vector<128x128xbf16>
    %cst_10 = arith.constant dense<0.000000e+00> : vector<16x128xf32>
    %13 = tpu.matmul %11, %12, %cst_10 {dimension_numbers = #tpu.dot_dimension_numbers<[1], [0], [0], [1], [0, 0, 1, 1], [], []>} : vector<16x128xbf16>, vector<128x128xbf16>, vector<16x128xf32> -> vector<16x128xf32>
    %c0_11 = arith.constant 0 : index
    %c0_12 = arith.constant 0 : index
    %14 = vector.load %arg13[%c0_11, %c0_12] : memref<1x128xf32, #tpu.memory_space<vmem>>, vector<1x128xf32>
    %15 = vector.broadcast %14 : vector<1x128xf32> to vector<16x128xf32>
    %16 = arith.addf %13, %15 : vector<16x128xf32>
    %17 = vector.extract_strided_slice %16 {offsets = [0, 0], sizes = [8, 128], strides = [1, 1]} : vector<16x128xf32> to vector<8x128xf32>
    %18 = arith.truncf %17 : vector<8x128xf32> to vector<8x128xbf16>
    %19 = vector.extract_strided_slice %16 {offsets = [8, 0], sizes = [8, 128], strides = [1, 1]} : vector<16x128xf32> to vector<8x128xf32>
    %c0_13 = arith.constant 0 : index
    %c0_14 = arith.constant 0 : index
    %20 = vector.load %arg2[%c0_13, %c0_14] : memref<8x128xf32, #tpu.memory_space<vmem>>, vector<8x128xf32>
    %c0_15 = arith.constant 0 : index
    %c0_16 = arith.constant 0 : index
    %21 = vector.load %arg6[%c0_15, %c0_16] : memref<128x128xbf16, #tpu.memory_space<vmem>>, vector<128x128xbf16>
    %cst_17 = arith.constant dense<0.000000e+00> : vector<8x128xf32>
    %22 = tpu.matmul %18, %21, %cst_17 {dimension_numbers = #tpu.dot_dimension_numbers<[1], [0], [0], [1], [0, 0, 1, 1], [], []>} : vector<8x128xbf16>, vector<128x128xbf16>, vector<8x128xf32> -> vector<8x128xf32>
    %23 = arith.truncf %20 : vector<8x128xf32> to vector<8x128xbf16>
    %c0_18 = arith.constant 0 : index
    %c0_19 = arith.constant 0 : index
    %24 = vector.load %arg7[%c0_18, %c0_19] : memref<128x128xbf16, #tpu.memory_space<vmem>>, vector<128x128xbf16>
    %cst_20 = arith.constant dense<0.000000e+00> : vector<8x128xf32>
    %25 = tpu.matmul %23, %24, %cst_20 {dimension_numbers = #tpu.dot_dimension_numbers<[1], [0], [0], [1], [0, 0, 1, 1], [], []>} : vector<8x128xbf16>, vector<128x128xbf16>, vector<8x128xf32> -> vector<8x128xf32>
    %26 = arith.addf %22, %25 : vector<8x128xf32>
    %c0_21 = arith.constant 0 : index
    %c0_22 = arith.constant 0 : index
    %27 = vector.load %arg14[%c0_21, %c0_22] : memref<1x128xf32, #tpu.memory_space<vmem>>, vector<1x128xf32>
    %28 = vector.broadcast %27 : vector<1x128xf32> to vector<8x128xf32>
    %29 = arith.addf %26, %28 : vector<8x128xf32>
    %cst_23 = arith.constant 0.000000e+00 : f32
    %30 = vector.broadcast %cst_23 : f32 to vector<8x128xf32>
    %31 = arith.maximumf %29, %30 : vector<8x128xf32>
    %32 = arith.truncf %31 : vector<8x128xf32> to vector<8x128xbf16>
    %c0_24 = arith.constant 0 : index
    %c0_25 = arith.constant 0 : index
    %33 = vector.load %arg8[%c0_24, %c0_25] : memref<128x128xbf16, #tpu.memory_space<vmem>>, vector<128x128xbf16>
    %cst_26 = arith.constant dense<0.000000e+00> : vector<8x128xf32>
    %34 = tpu.matmul %32, %33, %cst_26 {dimension_numbers = #tpu.dot_dimension_numbers<[1], [0], [0], [1], [0, 0, 1, 1], [], []>} : vector<8x128xbf16>, vector<128x128xbf16>, vector<8x128xf32> -> vector<8x128xf32>
    %c0_27 = arith.constant 0 : index
    %c0_28 = arith.constant 0 : index
    %35 = vector.load %arg15[%c0_27, %c0_28] : memref<1x128xf32, #tpu.memory_space<vmem>>, vector<1x128xf32>
    %36 = vector.broadcast %35 : vector<1x128xf32> to vector<8x128xf32>
    %37 = arith.addf %34, %36 : vector<8x128xf32>
    %c0_29 = arith.constant 0 : index
    %c0_30 = arith.constant 0 : index
    %38 = vector.load %arg9[%c0_29, %c0_30] : memref<128x128xbf16, #tpu.memory_space<vmem>>, vector<128x128xbf16>
    %cst_31 = arith.constant dense<0.000000e+00> : vector<8x128xf32>
    %39 = tpu.matmul %18, %38, %cst_31 {dimension_numbers = #tpu.dot_dimension_numbers<[1], [0], [0], [1], [0, 0, 1, 1], [], []>} : vector<8x128xbf16>, vector<128x128xbf16>, vector<8x128xf32> -> vector<8x128xf32>
    %40 = arith.truncf %19 : vector<8x128xf32> to vector<8x128xbf16>
    %c0_32 = arith.constant 0 : index
    %c0_33 = arith.constant 0 : index
    %41 = vector.load %arg10[%c0_32, %c0_33] : memref<128x128xbf16, #tpu.memory_space<vmem>>, vector<128x128xbf16>
    %cst_34 = arith.constant dense<0.000000e+00> : vector<8x128xf32>
    %42 = tpu.matmul %40, %41, %cst_34 {dimension_numbers = #tpu.dot_dimension_numbers<[1], [0], [0], [1], [0, 0, 1, 1], [], []>} : vector<8x128xbf16>, vector<128x128xbf16>, vector<8x128xf32> -> vector<8x128xf32>
    %43 = arith.addf %39, %42 : vector<8x128xf32>
    %c0_35 = arith.constant 0 : index
    %c0_36 = arith.constant 0 : index
    %44 = vector.load %arg16[%c0_35, %c0_36] : memref<1x128xf32, #tpu.memory_space<vmem>>, vector<1x128xf32>
    %45 = vector.broadcast %44 : vector<1x128xf32> to vector<8x128xf32>
    %46 = arith.addf %43, %45 : vector<8x128xf32>
    %cst_37 = arith.constant 0.000000e+00 : f32
    %47 = vector.broadcast %cst_37 : f32 to vector<8x128xf32>
    %48 = arith.maximumf %46, %47 : vector<8x128xf32>
    %49 = arith.truncf %48 : vector<8x128xf32> to vector<8x128xbf16>
    %c0_38 = arith.constant 0 : index
    %c0_39 = arith.constant 0 : index
    %50 = vector.load %arg11[%c0_38, %c0_39] : memref<128x128xbf16, #tpu.memory_space<vmem>>, vector<128x128xbf16>
    %cst_40 = arith.constant dense<0.000000e+00> : vector<8x128xf32>
    %51 = tpu.matmul %49, %50, %cst_40 {dimension_numbers = #tpu.dot_dimension_numbers<[1], [0], [0], [1], [0, 0, 1, 1], [], []>} : vector<8x128xbf16>, vector<128x128xbf16>, vector<8x128xf32> -> vector<8x128xf32>
    %c0_41 = arith.constant 0 : index
    %c0_42 = arith.constant 0 : index
    %52 = vector.load %arg17[%c0_41, %c0_42] : memref<1x128xf32, #tpu.memory_space<vmem>>, vector<1x128xf32>
    %53 = vector.broadcast %52 : vector<1x128xf32> to vector<8x128xf32>
    %54 = arith.addf %51, %53 : vector<8x128xf32>
    %55 = math.tanh %54 : vector<8x128xf32>
    %56 = arith.subf %19, %37 : vector<8x128xf32>
    %57 = arith.subf %20, %55 : vector<8x128xf32>
    %58 = arith.mulf %56, %56 : vector<8x128xf32>
    %cst_43 = arith.constant dense<0.000000e+00> : vector<8xf32>
    %59 = vector.multi_reduction <add>, %58, %cst_43 [1] : vector<8x128xf32> to vector<8xf32>
    %60 = vector.shape_cast %59 : vector<8xf32> to vector<8x1xf32>
    %61 = math.sqrt %60 : vector<8x1xf32>
    %c0_44 = arith.constant 0 : index
    %c0_45 = arith.constant 0 : index
    %62 = vector.load %arg18[%c0_44, %c0_45] : memref<8x2xf32, #tpu.memory_space<vmem>>, vector<8x1xf32>
    tpu.vector_store %arg18[%c0_44, %c0_45], %61 {strides = array<i32>} : memref<8x2xf32, #tpu.memory_space<vmem>>, vector<8x1xf32>,
    %63 = arith.mulf %57, %57 : vector<8x128xf32>
    %cst_46 = arith.constant dense<0.000000e+00> : vector<8xf32>
    %64 = vector.multi_reduction <add>, %63, %cst_46 [1] : vector<8x128xf32> to vector<8xf32>
    %65 = vector.shape_cast %64 : vector<8xf32> to vector<8x1xf32>
    %66 = math.sqrt %65 : vector<8x1xf32>
    %c0_47 = arith.constant 0 : index
    %c1 = arith.constant 1 : index
    %67 = vector.load %arg18[%c0_47, %c1] : memref<8x2xf32, #tpu.memory_space<vmem>>, vector<8x1xf32>
    tpu.vector_store %arg18[%c0_47, %c1], %66 {strides = array<i32>} : memref<8x2xf32, #tpu.memory_space<vmem>>, vector<8x1xf32>,
    return
  }
  func.func @transform_0(%arg0: i32) -> (i32, i32) {
    %c0_i32 = arith.constant 0 : i32
    %c0_i32_0 = arith.constant 0 : i32
    return %arg0, %c0_i32 : i32, i32
  }
  func.func @transform_1(%arg0: i32) -> (i32, i32) {
    %c0_i32 = arith.constant 0 : i32
    %c0_i32_0 = arith.constant 0 : i32
    return %arg0, %c0_i32 : i32, i32
  }
  func.func @transform_2(%arg0: i32) -> (i32, i32) {
    %c0_i32 = arith.constant 0 : i32
    %c0_i32_0 = arith.constant 0 : i32
    return %arg0, %c0_i32 : i32, i32
  }
  func.func @transform_3(%arg0: i32) -> (i32, i32) {
    %c0_i32 = arith.constant 0 : i32
    %c0_i32_0 = arith.constant 0 : i32
    %c0_i32_1 = arith.constant 0 : i32
    return %c0_i32, %c0_i32_0 : i32, i32
  }
  func.func @transform_4(%arg0: i32) -> (i32, i32) {
    %c0_i32 = arith.constant 0 : i32
    %c0_i32_0 = arith.constant 0 : i32
    %c0_i32_1 = arith.constant 0 : i32
    return %c0_i32, %c0_i32_0 : i32, i32
  }
  func.func @transform_5(%arg0: i32) -> (i32, i32) {
    %c0_i32 = arith.constant 0 : i32
    %c0_i32_0 = arith.constant 0 : i32
    %c0_i32_1 = arith.constant 0 : i32
    return %c0_i32, %c0_i32_0 : i32, i32
  }
  func.func @transform_6(%arg0: i32) -> (i32, i32) {
    %c0_i32 = arith.constant 0 : i32
    %c0_i32_0 = arith.constant 0 : i32
    %c0_i32_1 = arith.constant 0 : i32
    return %c0_i32, %c0_i32_0 : i32, i32
  }
  func.func @transform_7(%arg0: i32) -> (i32, i32) {
    %c0_i32 = arith.constant 0 : i32
    %c0_i32_0 = arith.constant 0 : i32
    %c0_i32_1 = arith.constant 0 : i32
    return %c0_i32, %c0_i32_0 : i32, i32
  }
  func.func @transform_8(%arg0: i32) -> (i32, i32) {
    %c0_i32 = arith.constant 0 : i32
    %c0_i32_0 = arith.constant 0 : i32
    %c0_i32_1 = arith.constant 0 : i32
    return %c0_i32, %c0_i32_0 : i32, i32
  }
  func.func @transform_9(%arg0: i32) -> (i32, i32) {
    %c0_i32 = arith.constant 0 : i32
    %c0_i32_0 = arith.constant 0 : i32
    %c0_i32_1 = arith.constant 0 : i32
    return %c0_i32, %c0_i32_0 : i32, i32
  }
  func.func @transform_10(%arg0: i32) -> (i32, i32) {
    %c0_i32 = arith.constant 0 : i32
    %c0_i32_0 = arith.constant 0 : i32
    %c0_i32_1 = arith.constant 0 : i32
    return %c0_i32, %c0_i32_0 : i32, i32
  }
  func.func @transform_11(%arg0: i32) -> (i32, i32) {
    %c0_i32 = arith.constant 0 : i32
    %c0_i32_0 = arith.constant 0 : i32
    %c0_i32_1 = arith.constant 0 : i32
    return %c0_i32, %c0_i32_0 : i32, i32
  }
  func.func @transform_12(%arg0: i32) -> (i32, i32) {
    %c0_i32 = arith.constant 0 : i32
    %c0_i32_0 = arith.constant 0 : i32
    %c0_i32_1 = arith.constant 0 : i32
    return %c0_i32, %c0_i32_0 : i32, i32
  }
  func.func @transform_13(%arg0: i32) -> (i32, i32) {
    %c0_i32 = arith.constant 0 : i32
    %c0_i32_0 = arith.constant 0 : i32
    %c0_i32_1 = arith.constant 0 : i32
    return %c0_i32, %c0_i32_0 : i32, i32
  }
  func.func @transform_14(%arg0: i32) -> (i32, i32) {
    %c0_i32 = arith.constant 0 : i32
    %c0_i32_0 = arith.constant 0 : i32
    %c0_i32_1 = arith.constant 0 : i32
    return %c0_i32, %c0_i32_0 : i32, i32
  }
  func.func @transform_15(%arg0: i32) -> (i32, i32) {
    %c0_i32 = arith.constant 0 : i32
    %c0_i32_0 = arith.constant 0 : i32
    %c0_i32_1 = arith.constant 0 : i32
    return %c0_i32, %c0_i32_0 : i32, i32
  }
  func.func @transform_16(%arg0: i32) -> (i32, i32) {
    %c0_i32 = arith.constant 0 : i32
    %c0_i32_0 = arith.constant 0 : i32
    %c0_i32_1 = arith.constant 0 : i32
    return %c0_i32, %c0_i32_0 : i32, i32
  }
  func.func @transform_17(%arg0: i32) -> (i32, i32) {
    %c0_i32 = arith.constant 0 : i32
    %c0_i32_0 = arith.constant 0 : i32
    return %arg0, %c0_i32 : i32, i32
  }
}

module attributes {stable_mosaic.version = 11 : i64} {
  func.func @_icm_kernel(%arg0: i32, %arg1: memref<8x128xf32, #tpu.memory_space<vmem>>, %arg2: memref<8x128xf32, #tpu.memory_space<vmem>>, %arg3: memref<8x128xf32, #tpu.memory_space<vmem>>, %arg4: memref<128x128xbf16, #tpu.memory_space<vmem>>, %arg5: memref<128x128xbf16, #tpu.memory_space<vmem>>, %arg6: memref<128x128xbf16, #tpu.memory_space<vmem>>, %arg7: memref<128x128xbf16, #tpu.memory_space<vmem>>, %arg8: memref<128x128xbf16, #tpu.memory_space<vmem>>, %arg9: memref<128x128xbf16, #tpu.memory_space<vmem>>, %arg10: memref<128x128xbf16, #tpu.memory_space<vmem>>, %arg11: memref<128x128xbf16, #tpu.memory_space<vmem>>, %arg12: memref<1x128xf32, #tpu.memory_space<vmem>>, %arg13: memref<1x128xf32, #tpu.memory_space<vmem>>, %arg14: memref<1x128xf32, #tpu.memory_space<vmem>>, %arg15: memref<1x128xf32, #tpu.memory_space<vmem>>, %arg16: memref<1x128xf32, #tpu.memory_space<vmem>>, %arg17: memref<1x128xf32, #tpu.memory_space<vmem>>, %arg18: memref<8x2xf32, #tpu.memory_space<vmem>>) attributes {dimension_semantics = [#tpu.dimension_semantics<parallel>], iteration_bounds = array<i64: 1>, scalar_prefetch = 0 : i64, scratch_operands = 0 : i64, tpu.core_type = #tpu.core_type<tc>, window_params = [{transform_indices = @transform_0, window_bounds = array<i64: 8, 128>}, {transform_indices = @transform_1, window_bounds = array<i64: 8, 128>}, {transform_indices = @transform_2, window_bounds = array<i64: 8, 128>}, {pipeline_mode = #tpu.pipeline_mode<synchronous>, transform_indices = @transform_3, window_bounds = array<i64: 128, 128>}, {pipeline_mode = #tpu.pipeline_mode<synchronous>, transform_indices = @transform_4, window_bounds = array<i64: 128, 128>}, {pipeline_mode = #tpu.pipeline_mode<synchronous>, transform_indices = @transform_5, window_bounds = array<i64: 128, 128>}, {pipeline_mode = #tpu.pipeline_mode<synchronous>, transform_indices = @transform_6, window_bounds = array<i64: 128, 128>}, {pipeline_mode = #tpu.pipeline_mode<synchronous>, transform_indices = @transform_7, window_bounds = array<i64: 128, 128>}, {pipeline_mode = #tpu.pipeline_mode<synchronous>, transform_indices = @transform_8, window_bounds = array<i64: 128, 128>}, {pipeline_mode = #tpu.pipeline_mode<synchronous>, transform_indices = @transform_9, window_bounds = array<i64: 128, 128>}, {pipeline_mode = #tpu.pipeline_mode<synchronous>, transform_indices = @transform_10, window_bounds = array<i64: 128, 128>}, {pipeline_mode = #tpu.pipeline_mode<synchronous>, transform_indices = @transform_11, window_bounds = array<i64: 1, 128>}, {pipeline_mode = #tpu.pipeline_mode<synchronous>, transform_indices = @transform_12, window_bounds = array<i64: 1, 128>}, {pipeline_mode = #tpu.pipeline_mode<synchronous>, transform_indices = @transform_13, window_bounds = array<i64: 1, 128>}, {pipeline_mode = #tpu.pipeline_mode<synchronous>, transform_indices = @transform_14, window_bounds = array<i64: 1, 128>}, {pipeline_mode = #tpu.pipeline_mode<synchronous>, transform_indices = @transform_15, window_bounds = array<i64: 1, 128>}, {pipeline_mode = #tpu.pipeline_mode<synchronous>, transform_indices = @transform_16, window_bounds = array<i64: 1, 128>}, {transform_indices = @transform_17, window_bounds = array<i64: 8, 2>}]} {
    %c0 = arith.constant 0 : index
    %c0_0 = arith.constant 0 : index
    %0 = vector.load %arg1[%c0, %c0_0] : memref<8x128xf32, #tpu.memory_space<vmem>>, vector<8x128xf32>
    %c0_1 = arith.constant 0 : index
    %c0_2 = arith.constant 0 : index
    %1 = vector.load %arg3[%c0_1, %c0_2] : memref<8x128xf32, #tpu.memory_space<vmem>>, vector<8x128xf32>
    %2 = tpu.concatenate %0, %1 in 0 : vector<8x128xf32>, vector<8x128xf32> -> vector<16x128xf32>
    %3 = arith.truncf %2 : vector<16x128xf32> to vector<16x128xbf16>
    %c0_3 = arith.constant 0 : index
    %c0_4 = arith.constant 0 : index
    %4 = vector.load %arg4[%c0_3, %c0_4] : memref<128x128xbf16, #tpu.memory_space<vmem>>, vector<128x128xbf16>
    %cst = arith.constant dense<0.000000e+00> : vector<16x128xf32>
    %5 = tpu.matmul %3, %4, %cst {dimension_numbers = #tpu.dot_dimension_numbers<[1], [0], [0], [1], [0, 0, 1, 1], [], []>} : vector<16x128xbf16>, vector<128x128xbf16>, vector<16x128xf32> -> vector<16x128xf32>
    %c0_5 = arith.constant 0 : index
    %c0_6 = arith.constant 0 : index
    %6 = vector.load %arg12[%c0_5, %c0_6] : memref<1x128xf32, #tpu.memory_space<vmem>>, vector<1x128xf32>
    %7 = vector.broadcast %6 : vector<1x128xf32> to vector<16x128xf32>
    %8 = arith.addf %5, %7 : vector<16x128xf32>
    %cst_7 = arith.constant 0.000000e+00 : f32
    %9 = vector.broadcast %cst_7 : f32 to vector<16x128xf32>
    %10 = arith.maximumf %8, %9 : vector<16x128xf32>
    %11 = arith.truncf %10 : vector<16x128xf32> to vector<16x128xbf16>
    %c0_8 = arith.constant 0 : index
    %c0_9 = arith.constant 0 : index
    %12 = vector.load %arg5[%c0_8, %c0_9] : memref<128x128xbf16, #tpu.memory_space<vmem>>, vector<128x128xbf16>
    %cst_10 = arith.constant dense<0.000000e+00> : vector<16x128xf32>
    %13 = tpu.matmul %11, %12, %cst_10 {dimension_numbers = #tpu.dot_dimension_numbers<[1], [0], [0], [1], [0, 0, 1, 1], [], []>} : vector<16x128xbf16>, vector<128x128xbf16>, vector<16x128xf32> -> vector<16x128xf32>
    %c0_11 = arith.constant 0 : index
    %c0_12 = arith.constant 0 : index
    %14 = vector.load %arg13[%c0_11, %c0_12] : memref<1x128xf32, #tpu.memory_space<vmem>>, vector<1x128xf32>
    %15 = vector.broadcast %14 : vector<1x128xf32> to vector<16x128xf32>
    %16 = arith.addf %13, %15 : vector<16x128xf32>
    %17 = vector.extract_strided_slice %16 {offsets = [0, 0], sizes = [8, 128], strides = [1, 1]} : vector<16x128xf32> to vector<8x128xf32>
    %18 = arith.truncf %17 : vector<8x128xf32> to vector<8x128xbf16>
    %19 = vector.extract_strided_slice %16 {offsets = [8, 0], sizes = [8, 128], strides = [1, 1]} : vector<16x128xf32> to vector<8x128xf32>
    %c0_13 = arith.constant 0 : index
    %c0_14 = arith.constant 0 : index
    %20 = vector.load %arg2[%c0_13, %c0_14] : memref<8x128xf32, #tpu.memory_space<vmem>>, vector<8x128xf32>
    %c0_15 = arith.constant 0 : index
    %c0_16 = arith.constant 0 : index
    %21 = vector.load %arg6[%c0_15, %c0_16] : memref<128x128xbf16, #tpu.memory_space<vmem>>, vector<128x128xbf16>
    %cst_17 = arith.constant dense<0.000000e+00> : vector<8x128xf32>
    %22 = tpu.matmul %18, %21, %cst_17 {dimension_numbers = #tpu.dot_dimension_numbers<[1], [0], [0], [1], [0, 0, 1, 1], [], []>} : vector<8x128xbf16>, vector<128x128xbf16>, vector<8x128xf32> -> vector<8x128xf32>
    %23 = arith.truncf %20 : vector<8x128xf32> to vector<8x128xbf16>
    %c0_18 = arith.constant 0 : index
    %c0_19 = arith.constant 0 : index
    %24 = vector.load %arg7[%c0_18, %c0_19] : memref<128x128xbf16, #tpu.memory_space<vmem>>, vector<128x128xbf16>
    %cst_20 = arith.constant dense<0.000000e+00> : vector<8x128xf32>
    %25 = tpu.matmul %23, %24, %cst_20 {dimension_numbers = #tpu.dot_dimension_numbers<[1], [0], [0], [1], [0, 0, 1, 1], [], []>} : vector<8x128xbf16>, vector<128x128xbf16>, vector<8x128xf32> -> vector<8x128xf32>
    %26 = arith.addf %22, %25 : vector<8x128xf32>
    %c0_21 = arith.constant 0 : index
    %c0_22 = arith.constant 0 : index
    %27 = vector.load %arg14[%c0_21, %c0_22] : memref<1x128xf32, #tpu.memory_space<vmem>>, vector<1x128xf32>
    %28 = vector.broadcast %27 : vector<1x128xf32> to vector<8x128xf32>
    %29 = arith.addf %26, %28 : vector<8x128xf32>
    %cst_23 = arith.constant 0.000000e+00 : f32
    %30 = vector.broadcast %cst_23 : f32 to vector<8x128xf32>
    %31 = arith.maximumf %29, %30 : vector<8x128xf32>
    %32 = arith.truncf %31 : vector<8x128xf32> to vector<8x128xbf16>
    %c0_24 = arith.constant 0 : index
    %c0_25 = arith.constant 0 : index
    %33 = vector.load %arg8[%c0_24, %c0_25] : memref<128x128xbf16, #tpu.memory_space<vmem>>, vector<128x128xbf16>
    %cst_26 = arith.constant dense<0.000000e+00> : vector<8x128xf32>
    %34 = tpu.matmul %32, %33, %cst_26 {dimension_numbers = #tpu.dot_dimension_numbers<[1], [0], [0], [1], [0, 0, 1, 1], [], []>} : vector<8x128xbf16>, vector<128x128xbf16>, vector<8x128xf32> -> vector<8x128xf32>
    %c0_27 = arith.constant 0 : index
    %c0_28 = arith.constant 0 : index
    %35 = vector.load %arg15[%c0_27, %c0_28] : memref<1x128xf32, #tpu.memory_space<vmem>>, vector<1x128xf32>
    %36 = vector.broadcast %35 : vector<1x128xf32> to vector<8x128xf32>
    %37 = arith.addf %34, %36 : vector<8x128xf32>
    %c0_29 = arith.constant 0 : index
    %c0_30 = arith.constant 0 : index
    %38 = vector.load %arg9[%c0_29, %c0_30] : memref<128x128xbf16, #tpu.memory_space<vmem>>, vector<128x128xbf16>
    %cst_31 = arith.constant dense<0.000000e+00> : vector<8x128xf32>
    %39 = tpu.matmul %18, %38, %cst_31 {dimension_numbers = #tpu.dot_dimension_numbers<[1], [0], [0], [1], [0, 0, 1, 1], [], []>} : vector<8x128xbf16>, vector<128x128xbf16>, vector<8x128xf32> -> vector<8x128xf32>
    %40 = arith.truncf %19 : vector<8x128xf32> to vector<8x128xbf16>
    %c0_32 = arith.constant 0 : index
    %c0_33 = arith.constant 0 : index
    %41 = vector.load %arg10[%c0_32, %c0_33] : memref<128x128xbf16, #tpu.memory_space<vmem>>, vector<128x128xbf16>
    %cst_34 = arith.constant dense<0.000000e+00> : vector<8x128xf32>
    %42 = tpu.matmul %40, %41, %cst_34 {dimension_numbers = #tpu.dot_dimension_numbers<[1], [0], [0], [1], [0, 0, 1, 1], [], []>} : vector<8x128xbf16>, vector<128x128xbf16>, vector<8x128xf32> -> vector<8x128xf32>
    %43 = arith.addf %39, %42 : vector<8x128xf32>
    %c0_35 = arith.constant 0 : index
    %c0_36 = arith.constant 0 : index
    %44 = vector.load %arg16[%c0_35, %c0_36] : memref<1x128xf32, #tpu.memory_space<vmem>>, vector<1x128xf32>
    %45 = vector.broadcast %44 : vector<1x128xf32> to vector<8x128xf32>
    %46 = arith.addf %43, %45 : vector<8x128xf32>
    %cst_37 = arith.constant 0.000000e+00 : f32
    %47 = vector.broadcast %cst_37 : f32 to vector<8x128xf32>
    %48 = arith.maximumf %46, %47 : vector<8x128xf32>
    %49 = arith.truncf %48 : vector<8x128xf32> to vector<8x128xbf16>
    %c0_38 = arith.constant 0 : index
    %c0_39 = arith.constant 0 : index
    %50 = vector.load %arg11[%c0_38, %c0_39] : memref<128x128xbf16, #tpu.memory_space<vmem>>, vector<128x128xbf16>
    %cst_40 = arith.constant dense<0.000000e+00> : vector<8x128xf32>
    %51 = tpu.matmul %49, %50, %cst_40 {dimension_numbers = #tpu.dot_dimension_numbers<[1], [0], [0], [1], [0, 0, 1, 1], [], []>} : vector<8x128xbf16>, vector<128x128xbf16>, vector<8x128xf32> -> vector<8x128xf32>
    %c0_41 = arith.constant 0 : index
    %c0_42 = arith.constant 0 : index
    %52 = vector.load %arg17[%c0_41, %c0_42] : memref<1x128xf32, #tpu.memory_space<vmem>>, vector<1x128xf32>
    %53 = vector.broadcast %52 : vector<1x128xf32> to vector<8x128xf32>
    %54 = arith.addf %51, %53 : vector<8x128xf32>
    %55 = math.tanh %54 : vector<8x128xf32>
    %56 = arith.subf %19, %37 : vector<8x128xf32>
    %57 = arith.subf %20, %55 : vector<8x128xf32>
    %58 = arith.mulf %56, %56 : vector<8x128xf32>
    %cst_43 = arith.constant dense<0.000000e+00> : vector<8xf32>
    %59 = vector.multi_reduction <add>, %58, %cst_43 [1] : vector<8x128xf32> to vector<8xf32>
    %60 = vector.shape_cast %59 : vector<8xf32> to vector<8x1xf32>
    %61 = math.sqrt %60 : vector<8x1xf32>
    %c0_44 = arith.constant 0 : index
    %c0_45 = arith.constant 0 : index
    %62 = vector.load %arg18[%c0_44, %c0_45] : memref<8x2xf32, #tpu.memory_space<vmem>>, vector<8x1xf32>
    tpu.vector_store %arg18[%c0_44, %c0_45], %61 {strides = array<i32>} : memref<8x2xf32, #tpu.memory_space<vmem>>, vector<8x1xf32>,
    %63 = arith.mulf %57, %57 : vector<8x128xf32>
    %cst_46 = arith.constant dense<0.000000e+00> : vector<8xf32>
    %64 = vector.multi_reduction <add>, %63, %cst_46 [1] : vector<8x128xf32> to vector<8xf32>
    %65 = vector.shape_cast %64 : vector<8xf32> to vector<8x1xf32>
    %66 = math.sqrt %65 : vector<8x1xf32>
    %c0_47 = arith.constant 0 : index
    %c1 = arith.constant 1 : index
    %67 = vector.load %arg18[%c0_47, %c1] : memref<8x2xf32, #tpu.memory_space<vmem>>, vector<8x1xf32>
    tpu.vector_store %arg18[%c0_47, %c1], %66 {strides = array<i32>} : memref<8x2xf32, #tpu.memory_space<vmem>>, vector<8x1xf32>,
    return
  }
  func.func @transform_0(%arg0: i32) -> (i32, i32) {
    %c0_i32 = arith.constant 0 : i32
    %c0_i32_0 = arith.constant 0 : i32
    return %arg0, %c0_i32 : i32, i32
  }
  func.func @transform_1(%arg0: i32) -> (i32, i32) {
    %c0_i32 = arith.constant 0 : i32
    %c0_i32_0 = arith.constant 0 : i32
    return %arg0, %c0_i32 : i32, i32
  }
  func.func @transform_2(%arg0: i32) -> (i32, i32) {
    %c0_i32 = arith.constant 0 : i32
    %c0_i32_0 = arith.constant 0 : i32
    return %arg0, %c0_i32 : i32, i32
  }
  func.func @transform_3(%arg0: i32) -> (i32, i32) {
    %c0_i32 = arith.constant 0 : i32
    %c0_i32_0 = arith.constant 0 : i32
    %c0_i32_1 = arith.constant 0 : i32
    return %c0_i32, %c0_i32_0 : i32, i32
  }
  func.func @transform_4(%arg0: i32) -> (i32, i32) {
    %c0_i32 = arith.constant 0 : i32
    %c0_i32_0 = arith.constant 0 : i32
    %c0_i32_1 = arith.constant 0 : i32
    return %c0_i32, %c0_i32_0 : i32, i32
  }
  func.func @transform_5(%arg0: i32) -> (i32, i32) {
    %c0_i32 = arith.constant 0 : i32
    %c0_i32_0 = arith.constant 0 : i32
    %c0_i32_1 = arith.constant 0 : i32
    return %c0_i32, %c0_i32_0 : i32, i32
  }
  func.func @transform_6(%arg0: i32) -> (i32, i32) {
    %c0_i32 = arith.constant 0 : i32
    %c0_i32_0 = arith.constant 0 : i32
    %c0_i32_1 = arith.constant 0 : i32
    return %c0_i32, %c0_i32_0 : i32, i32
  }
  func.func @transform_7(%arg0: i32) -> (i32, i32) {
    %c0_i32 = arith.constant 0 : i32
    %c0_i32_0 = arith.constant 0 : i32
    %c0_i32_1 = arith.constant 0 : i32
    return %c0_i32, %c0_i32_0 : i32, i32
  }
  func.func @transform_8(%arg0: i32) -> (i32, i32) {
    %c0_i32 = arith.constant 0 : i32
    %c0_i32_0 = arith.constant 0 : i32
    %c0_i32_1 = arith.constant 0 : i32
    return %c0_i32, %c0_i32_0 : i32, i32
  }
  func.func @transform_9(%arg0: i32) -> (i32, i32) {
    %c0_i32 = arith.constant 0 : i32
    %c0_i32_0 = arith.constant 0 : i32
    %c0_i32_1 = arith.constant 0 : i32
    return %c0_i32, %c0_i32_0 : i32, i32
  }
  func.func @transform_10(%arg0: i32) -> (i32, i32) {
    %c0_i32 = arith.constant 0 : i32
    %c0_i32_0 = arith.constant 0 : i32
    %c0_i32_1 = arith.constant 0 : i32
    return %c0_i32, %c0_i32_0 : i32, i32
  }
  func.func @transform_11(%arg0: i32) -> (i32, i32) {
    %c0_i32 = arith.constant 0 : i32
    %c0_i32_0 = arith.constant 0 : i32
    %c0_i32_1 = arith.constant 0 : i32
    return %c0_i32, %c0_i32_0 : i32, i32
  }
  func.func @transform_12(%arg0: i32) -> (i32, i32) {
    %c0_i32 = arith.constant 0 : i32
    %c0_i32_0 = arith.constant 0 : i32
    %c0_i32_1 = arith.constant 0 : i32
    return %c0_i32, %c0_i32_0 : i32, i32
  }
  func.func @transform_13(%arg0: i32) -> (i32, i32) {
    %c0_i32 = arith.constant 0 : i32
    %c0_i32_0 = arith.constant 0 : i32
    %c0_i32_1 = arith.constant 0 : i32
    return %c0_i32, %c0_i32_0 : i32, i32
  }
  func.func @transform_14(%arg0: i32) -> (i32, i32) {
    %c0_i32 = arith.constant 0 : i32
    %c0_i32_0 = arith.constant 0 : i32
    %c0_i32_1 = arith.constant 0 : i32
    return %c0_i32, %c0_i32_0 : i32, i32
  }
  func.func @transform_15(%arg0: i32) -> (i32, i32) {
    %c0_i32 = arith.constant 0 : i32
    %c0_i32_0 = arith.constant 0 : i32
    %c0_i32_1 = arith.constant 0 : i32
    return %c0_i32, %c0_i32_0 : i32, i32
  }
  func.func @transform_16(%arg0: i32) -> (i32, i32) {
    %c0_i32 = arith.constant 0 : i32
    %c0_i32_0 = arith.constant 0 : i32
    %c0_i32_1 = arith.constant 0 : i32
    return %c0_i32, %c0_i32_0 : i32, i32
  }
  func.func @transform_17(%arg0: i32) -> (i32, i32) {
    %c0_i32 = arith.constant 0 : i32
    %c0_i32_0 = arith.constant 0 : i32
    return %arg0, %c0_i32 : i32, i32
  }
}

</mosaic_0001>

<bundles_post_ra>
// kernel: tpu_custom_call.1
= control target key start
LH: loop header
LB: loop body
LE: loop exit
PB: predicated region body
PF: predicated region fallthrough
CT: control target
= control target key end

     0   :  { %s2177_s0 = inlined_call_operand.hbm [shape: f32[8,128], index: 0, kind: input, shape index: {}]   ;;  %s2178_s1 = inlined_call_operand.hbm [shape: f32[8,128], index: 1, kind: input, shape index: {}]   ;;  %s2179_s2 = inlined_call_operand.hbm [shape: f32[8,128], index: 2, kind: input, shape index: {}]   ;;  %s2180_s3 = inlined_call_operand.hbm [shape: bf16[128,128], index: 3, kind: input, shape index: {}]   ;;  %s2181_s4 = inlined_call_operand.hbm [shape: bf16[128,128], index: 4, kind: input, shape index: {}]   ;;  %s2182_s5 = inlined_call_operand.hbm [shape: bf16[128,128], index: 5, kind: input, shape index: {}]   ;;  %s2183_s6 = inlined_call_operand.hbm [shape: bf16[128,128], index: 6, kind: input, shape index: {}]   ;;  %s2184_s7 = inlined_call_operand.hbm [shape: bf16[128,128], index: 7, kind: input, shape index: {}]   ;;  %s2185_s8 = inlined_call_operand.hbm [shape: bf16[128,128], index: 8, kind: input, shape index: {}]   ;;  %s2186_s9 = inlined_call_operand.hbm [shape: bf16[128,128], index: 9, kind: input, shape index: {}]   ;;  %s2187_s10 = inlined_call_operand.hbm [shape: bf16[128,128], index: 10, kind: input, shape index: {}]   ;;  %s2188_s11 = inlined_call_operand.vmem [shape: f32[1,128], index: 11, kind: input, shape index: {}]   ;;  %s2189_s12 = inlined_call_operand.vmem [shape: f32[1,128], index: 12, kind: input, shape index: {}]   ;;  %s2190_s13 = inlined_call_operand.vmem [shape: f32[1,128], index: 13, kind: input, shape index: {}]   ;;  %s2191_s14 = inlined_call_operand.vmem [shape: f32[1,128], index: 14, kind: input, shape index: {}]   ;;  %s2192_s15 = inlined_call_operand.vmem [shape: f32[1,128], index: 15, kind: input, shape index: {}]   ;;  %s2193_s16 = inlined_call_operand.vmem [shape: f32[1,128], index: 16, kind: input, shape index: {}]   ;;  %s2194_s17 = inlined_call_operand.vmem [shape: f32[8,2], index: 17, kind: output, shape index: {}]  }
   0x1   :  { %2197 = sst [smem:[#allocation25_spill]] %s2177_s0 }
   0x2   :  { %2198 = sst [smem:[#allocation26_spill]] %s2178_s1 }
   0x3   :  { %2199 = sst [smem:[#allocation27_spill]] %s2193_s16 }
   0x4   :  { %22 = vsyncpa [#allocation3], 0 }
   0x5   :  { %23 = vsyncpa [#allocation5], 0 }
   0x6   :  { %24 = vsyncpa [#allocation8], 0 }
   0x7   :  { %25 = vsyncpa [#allocation11], 0 }
   0x8   :  { %26 = vsyncpa [#allocation14], 0 }
   0x9   :  { %27 = vsyncpa [#allocation17], 0  ;;  %s1770_s24 = smov [#allocation4]   ;;  %s1771_s26 = smov [#allocation7]  }
   0xa   :  { %s44_s25 = sshll.u32 %s1770_s24, 4  ;;  %s63_s27 = sshll.u32 %s1771_s26, 4  ;;  %s45_s25 = int_to_ptr.vmem [resolvable:$true] %s44_s25  ;;  %s1875_s27 = int_to_ptr.vmem [resolvable:$true] %s63_s27 }
   0xb   :  { %s2200_s0 = sld [smem:[#allocation26_spill]] }
  0x11   :  { %s1516_s30 = scalar_lea.hbm %s2200_s0, 128 }
  0x12   :  { %p1517_p0 = scmp.ne.s32.totalorder %s2200_s0, %s1516_s30  ;;  %p1520_p1 = scmp.lt.u32.totalorder %s1516_s30, %s2200_s0 }
  0x14   :  { %p1522_p2 = pnand %p1520_p1, %p1517_p0 }
  0x16   :  { %1525 = shalt.err (!%p1522_p2)
}
  0x17   :  { %s1526_s21 = scalar_lea.vmem %s45_s25, 128  ;;  %p1531_p4 = scmp.lt.s32.totalorder %s45_s25, %s45_s25 }
  0x18   :  { %p1527_p3 = scmp.ne.s32.totalorder %s45_s25, %s1526_s21  ;;  %p1532_p5 = scmp.lt.s32.totalorder %s1526_s21, %s1526_s21 }
  0x1a   :  { %p1533_p6 = por %p1532_p5, %p1531_p4 }
  0x1c   :  { %p1534_p7 = pnand %p1533_p6, %p1527_p3 }
  0x1e   :  { %1537 = shalt.err (!%p1534_p7)
}
  0x1f   :  { %47 = dma.hbm_to_vmem [thread:$0]  %s2200_s0, 128, %s45_s25, [#allocation5]  }
  0x20   :  { %s1538_s28 = scalar_lea.hbm %s2180_s3, 1024 }
  0x21   :  { %p1539_p8 = scmp.ne.s32.totalorder %s2180_s3, %s1538_s28  ;;  %p1542_p9 = scmp.lt.u32.totalorder %s1538_s28, %s2180_s3 }
  0x23   :  { %p1544_p10 = pnand %p1542_p9, %p1539_p8 }
  0x25   :  { %1547 = shalt.err (!%p1544_p10)
}
  0x26   :  { %s1548_s1 = scalar_lea.vmem %s1875_s27, 1024  ;;  %p1553_p12 = scmp.lt.s32.totalorder %s1875_s27, %s1875_s27 }
  0x27   :  { %p1549_p11 = scmp.ne.s32.totalorder %s1875_s27, %s1548_s1  ;;  %p1554_p13 = scmp.lt.s32.totalorder %s1548_s1, %s1548_s1 }
  0x29   :  { %p1555_p0 = por %p1554_p13, %p1553_p12 }
  0x2b   :  { %p1556_p1 = pnand %p1555_p0, %p1549_p11 }
  0x2d   :  { %1559 = shalt.err (!%p1556_p1)
}
  0x2e   :  { %s1772_s25 = smov 64   ;;  %s1773_s0 = smov 4  }
  0x2f   :  { %69 = dma.hbm_to_vmem [thread:$0]  %s2180_s3, 1024, %s1875_s27, [#allocation8], %s1772_s25, %s1772_s25, %s1773_s0  }
  0x30   :  { %s1774_s22 = smov [#allocation10]   ;;  %s1775_s24 = smov [#allocation13]  }
  0x31   :  { %s87_s23 = sshll.u32 %s1774_s22, 4  ;;  %s111_s26 = sshll.u32 %s1775_s24, 4  ;;  %s88_s23 = int_to_ptr.vmem [resolvable:$true] %s87_s23  ;;  %s1909_s26 = int_to_ptr.vmem [resolvable:$true] %s111_s26 }
  0x32   :  { %s1560_s18 = scalar_lea.hbm %s2182_s5, 1024 }
  0x33   :  { %p1561_p2 = scmp.ne.s32.totalorder %s2182_s5, %s1560_s18  ;;  %p1564_p3 = scmp.lt.u32.totalorder %s1560_s18, %s2182_s5 }
  0x35   :  { %p1566_p4 = pnand %p1564_p3, %p1561_p2 }
  0x37   :  { %1569 = shalt.err (!%p1566_p4)
}
  0x38   :  { %s1570_s3 = scalar_lea.vmem %s88_s23, 1024  ;;  %p1575_p6 = scmp.lt.s32.totalorder %s88_s23, %s88_s23 }
  0x39   :  { %p1571_p5 = scmp.ne.s32.totalorder %s88_s23, %s1570_s3  ;;  %p1576_p7 = scmp.lt.s32.totalorder %s1570_s3, %s1570_s3 }
  0x3b   :  { %p1577_p8 = por %p1576_p7, %p1575_p6 }
  0x3d   :  { %p1578_p9 = pnand %p1577_p8, %p1571_p5 }
  0x3f   :  { %1581 = shalt.err (!%p1578_p9)
}
  0x40   :  { %93 = dma.hbm_to_vmem [thread:$0]  %s2182_s5, 1024, %s88_s23, [#allocation11], %s1772_s25, %s1772_s25, %s1773_s0  }
  0x41   :  { %s1582_s16 = scalar_lea.hbm %s2184_s7, 1024 }
  0x42   :  { %p1583_p10 = scmp.ne.s32.totalorder %s2184_s7, %s1582_s16  ;;  %p1586_p11 = scmp.lt.u32.totalorder %s1582_s16, %s2184_s7 }
  0x44   :  { %p1588_p12 = pnand %p1586_p11, %p1583_p10 }
  0x46   :  { %1591 = shalt.err (!%p1588_p12)
}
  0x47   :  { %s1592_s30 = scalar_lea.vmem %s1909_s26, 1024  ;;  %p1597_p0 = scmp.lt.s32.totalorder %s1909_s26, %s1909_s26 }
  0x48   :  { %p1593_p13 = scmp.ne.s32.totalorder %s1909_s26, %s1592_s30  ;;  %p1598_p1 = scmp.lt.s32.totalorder %s1592_s30, %s1592_s30 }
  0x4a   :  { %p1599_p2 = por %p1598_p1, %p1597_p0 }
  0x4c   :  { %p1600_p3 = pnand %p1599_p2, %p1593_p13 }
  0x4e   :  { %1603 = shalt.err (!%p1600_p3)
}
  0x4f   :  { %117 = dma.hbm_to_vmem [thread:$0]  %s2184_s7, 1024, %s1909_s26, [#allocation14], %s1772_s25, %s1772_s25, %s1773_s0  }
  0x50   :  { %s1776_s19 = smov [#allocation16]   ;;  %s1777_s3 = smov [#allocation2]  }
  0x51   :  { %s135_s1 = sshll.u32 %s1776_s19, 4  ;;  %s34_s27 = sshll.u32 %s1777_s3, 4  ;;  %s136_s1 = int_to_ptr.vmem [resolvable:$true] %s135_s1  ;;  %s35_s27 = int_to_ptr.vmem [resolvable:$true] %s34_s27 }
  0x52   :  { %s1604_s22 = scalar_lea.hbm %s2186_s9, 1024 }
  0x53   :  { %p1605_p4 = scmp.ne.s32.totalorder %s2186_s9, %s1604_s22  ;;  %p1608_p5 = scmp.lt.u32.totalorder %s1604_s22, %s2186_s9 }
  0x55   :  { %p1610_p6 = pnand %p1608_p5, %p1605_p4 }
  0x57   :  { %1613 = shalt.err (!%p1610_p6)
}
  0x58   :  { %s1614_s7 = scalar_lea.vmem %s136_s1, 1024  ;;  %p1619_p8 = scmp.lt.s32.totalorder %s136_s1, %s136_s1 }
  0x59   :  { %p1615_p7 = scmp.ne.s32.totalorder %s136_s1, %s1614_s7  ;;  %p1620_p9 = scmp.lt.s32.totalorder %s1614_s7, %s1614_s7 }
  0x5b   :  { %p1621_p10 = por %p1620_p9, %p1619_p8 }
  0x5d   :  { %p1622_p11 = pnand %p1621_p10, %p1615_p7 }
  0x5f   :  { %1625 = shalt.err (!%p1622_p11)
}
  0x60   :  { %141 = dma.hbm_to_vmem [thread:$0]  %s2186_s9, 1024, %s136_s1, [#allocation17], %s1772_s25, %s1772_s25, %s1773_s0  }
  0x61   :  { %s2201_s23 = sld [smem:[#allocation25_spill]] }
  0x67   :  { %s1626_s19 = scalar_lea.hbm %s2201_s23, 128 }
  0x68   :  { %p1627_p12 = scmp.ne.s32.totalorder %s2201_s23, %s1626_s19  ;;  %p1630_p13 = scmp.lt.u32.totalorder %s1626_s19, %s2201_s23 }
  0x6a   :  { %p1632_p0 = pnand %p1630_p13, %p1627_p12 }
  0x6c   :  { %1635 = shalt.err (!%p1632_p0)
}
  0x6d   :  { %s1636_s16 = scalar_lea.vmem %s35_s27, 128  ;;  %p1641_p2 = scmp.lt.s32.totalorder %s35_s27, %s35_s27 }
  0x6e   :  { %p1637_p1 = scmp.ne.s32.totalorder %s35_s27, %s1636_s16  ;;  %p1642_p3 = scmp.lt.s32.totalorder %s1636_s16, %s1636_s16 }
  0x70   :  { %p1643_p4 = por %p1642_p3, %p1641_p2 }
  0x72   :  { %p1644_p5 = pnand %p1643_p4, %p1637_p1 }
  0x74   :  { %1647 = shalt.err (!%p1644_p5)
}
  0x75   :  { %37 = dma.hbm_to_vmem [thread:$0]  %s2201_s23, 128, %s35_s27, [#allocation3]  }
  0x76   :  { %s1778_s24 = smov [#allocation6]   ;;  %s1779_s29 = smov [#allocation9]  }
  0x77   :  { %s54_s28 = sshll.u32 %s1778_s24, 4  ;;  %s75_s7 = sshll.u32 %s1779_s29, 4  ;;  %s55_s28 = int_to_ptr.vmem [resolvable:$true] %s54_s28  ;;  %s1973_s7 = int_to_ptr.vmem [resolvable:$true] %s75_s7 }
  0x78   :  { %s1648_s30 = scalar_lea.hbm %s2179_s2, 128 }
  0x79   :  { %p1649_p6 = scmp.ne.s32.totalorder %s2179_s2, %s1648_s30  ;;  %p1652_p7 = scmp.lt.u32.totalorder %s1648_s30, %s2179_s2 }
  0x7b   :  { %p1654_p8 = pnand %p1652_p7, %p1649_p6 }
  0x7d   :  { %1657 = shalt.err (!%p1654_p8)
}
  0x7e   :  { %s1658_s27 = scalar_lea.vmem %s55_s28, 128  ;;  %p1663_p10 = scmp.lt.s32.totalorder %s55_s28, %s55_s28 }
  0x7f   :  { %p1659_p9 = scmp.ne.s32.totalorder %s55_s28, %s1658_s27  ;;  %p1664_p11 = scmp.lt.s32.totalorder %s1658_s27, %s1658_s27 }
  0x81   :  { %p1665_p12 = por %p1664_p11, %p1663_p10 }
  0x83   :  { %p1666_p13 = pnand %p1665_p12, %p1659_p9 }
  0x85   :  { %1669 = shalt.err (!%p1666_p13)
}
  0x86   :  { %57 = dma.hbm_to_vmem [thread:$0]  %s2179_s2, 128, %s55_s28, [#allocation5]  }
  0x87   :  { %s1670_s9 = scalar_lea.hbm %s2181_s4, 1024 }
  0x88   :  { %p1671_p0 = scmp.ne.s32.totalorder %s2181_s4, %s1670_s9  ;;  %p1674_p1 = scmp.lt.u32.totalorder %s1670_s9, %s2181_s4 }
  0x8a   :  { %p1676_p2 = pnand %p1674_p1, %p1671_p0 }
  0x8c   :  { %1679 = shalt.err (!%p1676_p2)
}
  0x8d   :  { %s1680_s18 = scalar_lea.vmem %s1973_s7, 1024  ;;  %p1685_p4 = scmp.lt.s32.totalorder %s1973_s7, %s1973_s7 }
  0x8e   :  { %p1681_p3 = scmp.ne.s32.totalorder %s1973_s7, %s1680_s18  ;;  %p1686_p5 = scmp.lt.s32.totalorder %s1680_s18, %s1680_s18 }
  0x90   :  { %p1687_p6 = por %p1686_p5, %p1685_p4 }
  0x92   :  { %p1688_p7 = pnand %p1687_p6, %p1681_p3 }
  0x94   :  { %1691 = shalt.err (!%p1688_p7)
}
  0x95   :  { %81 = dma.hbm_to_vmem [thread:$0]  %s2181_s4, 1024, %s1973_s7, [#allocation8], %s1772_s25, %s1772_s25, %s1773_s0  }
  0x96   :  { %s1780_s30 = smov [#allocation12]   ;;  %s1781_s19 = smov [#allocation15]  }
  0x97   :  { %s99_s5 = sshll.u32 %s1780_s30, 4  ;;  %s123_s3 = sshll.u32 %s1781_s19, 4  ;;  %s100_s5 = int_to_ptr.vmem [resolvable:$true] %s99_s5  ;;  %s2007_s3 = int_to_ptr.vmem [resolvable:$true] %s123_s3 }
  0x98   :  { %s1692_s23 = scalar_lea.hbm %s2183_s6, 1024 }
  0x99   :  { %p1693_p8 = scmp.ne.s32.totalorder %s2183_s6, %s1692_s23  ;;  %p1696_p9 = scmp.lt.u32.totalorder %s1692_s23, %s2183_s6 }
  0x9b   :  { %p1698_p10 = pnand %p1696_p9, %p1693_p8 }
  0x9d   :  { %1701 = shalt.err (!%p1698_p10)
}
  0x9e   :  { %s1702_s4 = scalar_lea.vmem %s100_s5, 1024  ;;  %p1707_p12 = scmp.lt.s32.totalorder %s100_s5, %s100_s5 }
  0x9f   :  { %p1703_p11 = scmp.ne.s32.totalorder %s100_s5, %s1702_s4  ;;  %p1708_p13 = scmp.lt.s32.totalorder %s1702_s4, %s1702_s4 }
  0xa1   :  { %p1709_p0 = por %p1708_p13, %p1707_p12 }
  0xa3   :  { %p1710_p1 = pnand %p1709_p0, %p1703_p11 }
  0xa5   :  { %1713 = shalt.err (!%p1710_p1)
}
  0xa6   :  { %105 = dma.hbm_to_vmem [thread:$0]  %s2183_s6, 1024, %s100_s5, [#allocation11], %s1772_s25, %s1772_s25, %s1773_s0  }
  0xa7   :  { %s1714_s26 = scalar_lea.hbm %s2185_s8, 1024 }
  0xa8   :  { %p1715_p2 = scmp.ne.s32.totalorder %s2185_s8, %s1714_s26  ;;  %p1718_p3 = scmp.lt.u32.totalorder %s1714_s26, %s2185_s8 }
  0xaa   :  { %p1720_p4 = pnand %p1718_p3, %p1715_p2 }
  0xac   :  { %1723 = shalt.err (!%p1720_p4)
}
  0xad   :  { %s1724_s19 = scalar_lea.vmem %s2007_s3, 1024  ;;  %p1729_p6 = scmp.lt.s32.totalorder %s2007_s3, %s2007_s3 }
  0xae   :  { %p1725_p5 = scmp.ne.s32.totalorder %s2007_s3, %s1724_s19  ;;  %p1730_p7 = scmp.lt.s32.totalorder %s1724_s19, %s1724_s19 }
  0xb0   :  { %p1731_p8 = por %p1730_p7, %p1729_p6 }
  0xb2   :  { %p1732_p9 = pnand %p1731_p8, %p1725_p5 }
  0xb4   :  { %1735 = shalt.err (!%p1732_p9)
}
  0xb5   :  { %129 = dma.hbm_to_vmem [thread:$0]  %s2185_s8, 1024, %s2007_s3, [#allocation14], %s1772_s25, %s1772_s25, %s1773_s0  }
  0xb6   :  { %s1782_s20 = smov [#allocation18]   ;;  %s1736_s22 = scalar_lea.hbm %s2187_s10, 1024 }
  0xb7   :  { %s147_s27 = sshll.u32 %s1782_s20, 4  ;;  %p1737_p10 = scmp.ne.s32.totalorder %s2187_s10, %s1736_s22  ;;  %s148_s27 = int_to_ptr.vmem [resolvable:$true] %s147_s27 }
  0xb8   :  { %p1740_p11 = scmp.lt.u32.totalorder %s1736_s22, %s2187_s10 }
  0xba   :  { %p1742_p12 = pnand %p1740_p11, %p1737_p10 }
  0xbc   :  { %1745 = shalt.err (!%p1742_p12)
}
  0xbd   :  { %s1746_s1 = scalar_lea.vmem %s148_s27, 1024  ;;  %p1751_p0 = scmp.lt.s32.totalorder %s148_s27, %s148_s27 }
  0xbe   :  { %p1747_p13 = scmp.ne.s32.totalorder %s148_s27, %s1746_s1  ;;  %p1752_p1 = scmp.lt.s32.totalorder %s1746_s1, %s1746_s1 }
  0xc0   :  { %p1753_p2 = por %p1752_p1, %p1751_p0 }
  0xc2   :  { %p1754_p3 = pnand %p1753_p2, %p1747_p13 }
  0xc4   :  { %1757 = shalt.err (!%p1754_p3)
}
  0xc5   :  { %153 = dma.hbm_to_vmem [thread:$0]  %s2187_s10, 1024, %s148_s27, [#allocation17], %s1772_s25, %s1772_s25, %s1773_s0  }
  0xc6   :  { %1758 = dma.done.wait [#allocation3], 128  }
  0xc7   :  { %1759 = vsyncadd [#allocation3], 4294967168 }
  0xc8   :  { %1760 = dma.done.wait [#allocation5], 256  }
  0xc9   :  { %1761 = vsyncadd [#allocation5], 4294967040 }
  0xca   :  { %1762 = dma.done.wait [#allocation8], 2048  }
  0xcb   :  { %1763 = vsyncadd [#allocation8], 4294965248 }
  0xcc   :  { %1764 = dma.done.wait [#allocation11], 2048  }
  0xcd   :  { %1765 = vsyncadd [#allocation11], 4294965248 }
  0xce   :  { %1766 = dma.done.wait [#allocation14], 2048  }
  0xcf   :  { %1767 = vsyncadd [#allocation14], 4294965248 }
  0xd0   :  { %1768 = dma.done.wait [#allocation17], 2048  }
  0xd1   :  { %1769 = vsyncadd [#allocation17], 4294965248  ;;  %v1783_v0 = vmov 0.0   ;;  %vm1784_vm0 = vmmov 0   ;;  %v1446_v1 = vld [vmem:[#allocation7] sm:$0xff]   ;;  %v1447_v2 = vld [vmem:[#allocation7 + $0x8] sm:$0xff]  }
  0xd2   :  { %1271 = vmatprep.subr.bf16.mxu0 %v1783_v0  ;;  %1287 = vmatprep.mubr.msk.bf16.mxu0 %vm1784_vm0, %v1783_v0  ;;  %v1448_v3 = vld [vmem:[#allocation7 + $0x10] sm:$0xff]   ;;  %v1454_v4 = vld [vmem:[#allocation9] sm:$0xff]   ;;  %v1449_v5 = vld [vmem:[#allocation7 + $0x18] sm:$0xff]   ;;  %vm1105_vm1 = vcmask 7168   ;;  %s2202_s30 = sld [smem:[#allocation27_spill]]  ;;  %vm1117_vm4 = vcmask 15368  }
  0xd3   :  { %1291 = vmatprep.subr.bf16.mxu1 %v1783_v0  ;;  %1307 = vmatprep.mubr.msk.bf16.mxu1 %vm1784_vm0, %v1783_v0  ;;  %v1455_v6 = vld [vmem:[#allocation9 + $0x8] sm:$0xff]   ;;  %v1450_v7 = vld [vmem:[#allocation7 + $0x20] sm:$0xff]   ;;  %v1456_v8 = vld [vmem:[#allocation9 + $0x10] sm:$0xff]  }
  0xd4   :  { %1272 = vmatpush3.bf16.msra.mxu0 %v1446_v1  ;;  %1292 = vmatpush3.bf16.msra.mxu1 %v1454_v4  ;;  %v1451_v9 = vld [vmem:[#allocation7 + $0x28] sm:$0xff]   ;;  %v1457_v10 = vld [vmem:[#allocation9 + $0x18] sm:$0xff]   ;;  %v1452_v11 = vld [vmem:[#allocation7 + $0x30] sm:$0xff]  }
  0xd5   :  { %1273 = vmatprep.subr.bf16.mxu0 %v1783_v0  ;;  %1293 = vmatprep.subr.bf16.mxu1 %v1783_v0  ;;  %v1458_v12 = vld [vmem:[#allocation9 + $0x20] sm:$0xff]   ;;  %v1453_v13 = vld [vmem:[#allocation7 + $0x38] sm:$0xff]   ;;  %v200_v14 = vld [vmem:[#allocation2] sm:$0xff] }
  0xd6   :  { %v201_v15 = vld [vmem:[#allocation6] sm:$0xff]  ;;  %v1459_v16 = vld [vmem:[#allocation9 + $0x28] sm:$0xff]   ;;  %v1460_v18 = vld [vmem:[#allocation9 + $0x30] sm:$0xff]  }
  0xd7   :  { %v202_v17 = vpack.c.bf16 %v201_v15, %v200_v14  ;;  %v1461_v19 = vld [vmem:[#allocation9 + $0x38] sm:$0xff]   ;;  %v1462_v20 = vld [vmem:[#allocation12] sm:$0xff]   ;;  %v1464_v21 = vld [vmem:[#allocation12 + $0x8] sm:$0xff]  }
  0xd8   :  { %1274 = vmatpush3.bf16.msra.mxu0 %v1447_v2  ;;  %1294 = vmatpush3.bf16.msra.mxu1 %v1455_v6  ;;  %v1466_v22 = vld [vmem:[#allocation12 + $0x10] sm:$0xff]   ;;  %v1468_v23 = vld [vmem:[#allocation12 + $0x18] sm:$0xff]   ;;  %v1470_v24 = vld [vmem:[#allocation12 + $0x20] sm:$0xff]  }
  0xd9   :  { %1275 = vmatprep.subr.bf16.mxu0 %v1783_v0  ;;  %1295 = vmatprep.subr.bf16.mxu1 %v1783_v0  ;;  %v1472_v25 = vld [vmem:[#allocation12 + $0x28] sm:$0xff]   ;;  %v1474_v26 = vld [vmem:[#allocation12 + $0x30] sm:$0xff]   ;;  %v1476_v27 = vld [vmem:[#allocation12 + $0x38] sm:$0xff]  }
  0xda   :  { %v1129_v28 = vld [vmem:[%s2188_s11] ss:$0 sm:$0xff]  ;;  %v1463_v37 = vld [vmem:[#allocation10] sm:$0xff]   ;;  %v1467_v40 = vld [vmem:[#allocation10 + $0x10] sm:$0xff]  }
  0xdb   :  { %v1465_v39 = vld [vmem:[#allocation10 + $0x8] sm:$0xff]   ;;  %v1469_v41 = vld [vmem:[#allocation10 + $0x18] sm:$0xff]   ;;  %v1471_v42 = vld [vmem:[#allocation10 + $0x20] sm:$0xff]  }
  0xdc   :  { %1276 = vmatpush3.bf16.msra.mxu0 %v1448_v3  ;;  %1296 = vmatpush3.bf16.msra.mxu1 %v1456_v8  ;;  %v1473_v43 = vld [vmem:[#allocation10 + $0x28] sm:$0xff]   ;;  %v1475_v44 = vld [vmem:[#allocation10 + $0x30] sm:$0xff]   ;;  %v1477_v45 = vld [vmem:[#allocation10 + $0x38] sm:$0xff]  }
  0xdd   :  { %1277 = vmatprep.subr.bf16.mxu0 %v1783_v0  ;;  %1297 = vmatprep.subr.bf16.mxu1 %v1783_v0  ;;  %v2103_v46 = vld [vmem:[#allocation4] sm:$0xff]  ;;  %v1486_v48 = vld [vmem:[#allocation13] sm:$0xff]   ;;  %v1487_v49 = vld [vmem:[#allocation13 + $0x8] sm:$0xff]  }
  0xde   :  { %v448_v47 = vpack.c.bf16 %v2103_v46, %v2103_v46  ;;  %v1488_v50 = vld [vmem:[#allocation13 + $0x10] sm:$0xff]   ;;  %v1489_v51 = vld [vmem:[#allocation13 + $0x18] sm:$0xff]   ;;  %v1490_v52 = vld [vmem:[#allocation13 + $0x20] sm:$0xff]  }
  0xdf   :  { %v1491_v53 = vld [vmem:[#allocation13 + $0x28] sm:$0xff]   ;;  %v1478_v59 = vld [vmem:[#allocation16] sm:$0xff]   ;;  %v1480_v63 = vld [vmem:[#allocation16 + $0x10] sm:$0xff]  }
  0xe0   :  { %1278 = vmatpush3.bf16.msra.mxu0 %v1449_v5  ;;  %1298 = vmatpush3.bf16.msra.mxu1 %v1457_v10  ;;  %v1138_v54 = vld [vmem:[%s2189_s12] ss:$0 sm:$0xff]  ;;  %v1481_v1 = vld [vmem:[#allocation16 + $0x18] sm:$0xff]   ;;  %v1482_v2 = vld [vmem:[#allocation16 + $0x20] sm:$0xff]  }
  0xe1   :  { %1279 = vmatprep.subr.bf16.mxu0 %v1783_v0  ;;  %1299 = vmatprep.subr.bf16.mxu1 %v1783_v0  ;;  %v1479_v62 = vld [vmem:[#allocation16 + $0x8] sm:$0xff]   ;;  %v1484_v4 = vld [vmem:[#allocation16 + $0x30] sm:$0xff]   ;;  %v1485_v5 = vld [vmem:[#allocation16 + $0x38] sm:$0xff]  }
  0xe2   :  { %v1483_v3 = vld [vmem:[#allocation16 + $0x28] sm:$0xff]  }
  0xe3   :  { %v1163_v15 = vld [vmem:[%s2190_s13] ss:$0 sm:$0xff] }
  0xe4   :  { %1280 = vmatpush3.bf16.msra.mxu0 %v1450_v7  ;;  %1300 = vmatpush3.bf16.msra.mxu1 %v1458_v12  ;;  %v1492_v12 = vld [vmem:[#allocation13 + $0x30] sm:$0xff]  }
  0xe5   :  { %1281 = vmatprep.subr.bf16.mxu0 %v1783_v0  ;;  %1301 = vmatprep.subr.bf16.mxu1 %v1783_v0 }
  0xe8   :  { %1282 = vmatpush3.bf16.msra.mxu0 %v1451_v9  ;;  %1302 = vmatpush3.bf16.msra.mxu1 %v1459_v16 }
  0xe9   :  { %1283 = vmatprep.subr.bf16.mxu0 %v1783_v0  ;;  %1303 = vmatprep.subr.bf16.mxu1 %v1783_v0 }
  0xec   :  { %1284 = vmatpush3.bf16.msra.mxu0 %v1452_v11  ;;  %1304 = vmatpush3.bf16.msra.mxu1 %v1460_v18 }
  0xed   :  { %1285 = vmatprep.subr.bf16.mxu0 %v1783_v0  ;;  %1305 = vmatprep.subr.bf16.mxu1 %v1783_v0 }
  0xf0   :  { %1286 = vmatpush3.bf16.msra.mxu0 %v1453_v13  ;;  %1306 = vmatpush3.bf16.msra.mxu1 %v1461_v19  ;;  %v1493_v13 = vld [vmem:[#allocation13 + $0x38] sm:$0xff]  }
  0xf1   :  { %1311 = vmatprep.subr.bf16.mxu0 %v1783_v0  ;;  %1331 = vmatprep.subr.bf16.mxu1 %v1783_v0 }
  0xf3   :  { %1288 = vmatmul.mubr.bf16.vlgmr.msra.gmra.mrb[0].mxu0 %v202_v17 }
  0xf4   :  { %1327 = vmatprep.mubr.msk.bf16.mxu0 %vm1784_vm0, %v1783_v0  ;;  %1312 = vmatpush3.bf16.msra.mxu0 %v1462_v20 }
  0xf5   :  { %1313 = vmatprep.subr.bf16.mxu0 %v1783_v0 }
  0xf8   :  { %1314 = vmatpush3.bf16.msra.mxu0 %v1464_v21 }
  0xf9   :  { %1315 = vmatprep.subr.bf16.mxu0 %v1783_v0 }
  0xfc   :  { %1316 = vmatpush3.bf16.msra.mxu0 %v1466_v22  ;;  %v1494_v22 = vld [vmem:[#allocation15] sm:$0xff]  }
  0xfd   :  { %1317 = vmatprep.subr.bf16.mxu0 %v1783_v0 }
 0x100   :  { %1318 = vmatpush3.bf16.msra.mxu0 %v1468_v23 }
 0x101   :  { %1319 = vmatprep.subr.bf16.mxu0 %v1783_v0 }
 0x104   :  { %1320 = vmatpush3.bf16.msra.mxu0 %v1470_v24  ;;  %v1495_v24 = vld [vmem:[#allocation15 + $0x8] sm:$0xff]  }
 0x105   :  { %1321 = vmatprep.subr.bf16.mxu0 %v1783_v0 }
 0x108   :  { %1322 = vmatpush3.bf16.msra.mxu0 %v1472_v25  ;;  %v1496_v25 = vld [vmem:[#allocation15 + $0x10] sm:$0xff]  }
 0x109   :  { %1323 = vmatprep.subr.bf16.mxu0 %v1783_v0 }
 0x10c   :  { %1324 = vmatpush3.bf16.msra.mxu0 %v1474_v26  ;;  %v1497_v26 = vld [vmem:[#allocation15 + $0x18] sm:$0xff]  }
 0x10d   :  { %1325 = vmatprep.subr.bf16.mxu0 %v1783_v0 }
 0x110   :  { %1326 = vmatpush3.bf16.msra.mxu0 %v1476_v27  ;;  %v1498_v27 = vld [vmem:[#allocation15 + $0x20] sm:$0xff]  }
 0x111   :  { %1351 = vmatprep.subr.bf16.mxu0 %v1783_v0 }
 0x113   :  { %1328 = vmatmul.mubr.bf16.vlgmr.msra.gmra.mrb[4].mxu0 %v448_v47 }
 0x114   :  { %1367 = vmatprep.mubr.msk.bf16.mxu0 %vm1784_vm0, %v1783_v0  ;;  %1352 = vmatpush3.bf16.msra.mxu0 %v1486_v48 }
 0x115   :  { %1353 = vmatprep.subr.bf16.mxu0 %v1783_v0 }
 0x118   :  { %1354 = vmatpush3.bf16.msra.mxu0 %v1487_v49 }
 0x119   :  { %1355 = vmatprep.subr.bf16.mxu0 %v1783_v0 }
 0x11c   :  { %1356 = vmatpush3.bf16.msra.mxu0 %v1488_v50 }
 0x11d   :  { %1357 = vmatprep.subr.bf16.mxu0 %v1783_v0 }
 0x120   :  { %1358 = vmatpush3.bf16.msra.mxu0 %v1489_v51 }
 0x121   :  { %1359 = vmatprep.subr.bf16.mxu0 %v1783_v0 }
 0x124   :  { %1360 = vmatpush3.bf16.msra.mxu0 %v1490_v52 }
 0x125   :  { %1361 = vmatprep.subr.bf16.mxu0 %v1783_v0 }
 0x128   :  { %1362 = vmatpush3.bf16.msra.mxu0 %v1491_v53 }
 0x129   :  { %1363 = vmatprep.subr.bf16.mxu0 %v1783_v0 }
 0x12c   :  { %1364 = vmatpush3.bf16.msra.mxu0 %v1492_v12 }
 0x12d   :  { %1365 = vmatprep.subr.bf16.mxu0 %v1783_v0 }
 0x130   :  { %1366 = vmatpush3.bf16.msra.mxu0 %v1493_v13 }
 0x131   :  { %1391 = vmatprep.subr.bf16.mxu0 %v1783_v0 }
 0x1c6   :  { %v308_v29 = vpop.f32.mrb[0].mxu0 }
 0x1c7   :  { %v309_v30 = vadd.f32 %v1129_v28, %v308_v29  ;;  %v1289_v31 = vpop.f32.mrb[1].mxu0  ;;  %v1500_v29 = vld [vmem:[#allocation15 + $0x30] sm:$0xff]  }
 0x1c8   :  { %v311_v32 = vpop.f32.mrb[2].mxu0 }
 0x1c9   :  { %v312_v33 = vadd.f32 %v1129_v28, %v311_v32  ;;  %v1290_v34 = vpop.f32.mrb[3].mxu0  ;;  %v315_v35 = vmax.f32 %v309_v30, 0.0  ;;  %v1499_v28 = vld [vmem:[#allocation15 + $0x28] sm:$0xff]  }
 0x1cb   :  { %v316_v36 = vmax.f32 %v312_v33, 0.0  ;;  %v1501_v33 = vld [vmem:[#allocation15 + $0x38] sm:$0xff]  }
 0x1cd   :  { %v317_v38 = vpack.c.bf16 %v316_v36, %v315_v35  ;;  %v1502_v35 = vld [vmem:[#allocation18] sm:$0xff]   ;;  %v1503_v36 = vld [vmem:[#allocation18 + $0x8] sm:$0xff]  }
 0x1cf   :  { %1308 = vmatmul.mubr.bf16.vlgmr.msra.gmra.mrb[0].mxu1 %v317_v38  ;;  %v1505_v38 = vld [vmem:[#allocation18 + $0x18] sm:$0xff]  }
 0x1d0   :  { %1332 = vmatpush3.bf16.msra.mxu1 %v1463_v37  ;;  %1347 = vmatprep.mubr.msk.bf16.mxu1 %vm1784_vm0, %v1783_v0  ;;  %v1504_v37 = vld [vmem:[#allocation18 + $0x10] sm:$0xff]  }
 0x1d1   :  { %1333 = vmatprep.subr.bf16.mxu1 %v1783_v0 }
 0x1d4   :  { %1334 = vmatpush3.bf16.msra.mxu1 %v1465_v39  ;;  %v1506_v39 = vld [vmem:[#allocation18 + $0x20] sm:$0xff]  }
 0x1d5   :  { %1335 = vmatprep.subr.bf16.mxu1 %v1783_v0 }
 0x1d8   :  { %1336 = vmatpush3.bf16.msra.mxu1 %v1467_v40  ;;  %v1507_v40 = vld [vmem:[#allocation18 + $0x28] sm:$0xff]  }
 0x1d9   :  { %1337 = vmatprep.subr.bf16.mxu1 %v1783_v0 }
 0x1dc   :  { %1338 = vmatpush3.bf16.msra.mxu1 %v1469_v41  ;;  %v1508_v41 = vld [vmem:[#allocation18 + $0x30] sm:$0xff]  }
 0x1dd   :  { %1339 = vmatprep.subr.bf16.mxu1 %v1783_v0 }
 0x1e0   :  { %1340 = vmatpush3.bf16.msra.mxu1 %v1471_v42  ;;  %v1509_v42 = vld [vmem:[#allocation18 + $0x38] sm:$0xff]  }
 0x1e1   :  { %1341 = vmatprep.subr.bf16.mxu1 %v1783_v0 }
 0x1e4   :  { %1342 = vmatpush3.bf16.msra.mxu1 %v1473_v43  ;;  %v1164_v43 = vld [vmem:[%s2191_s14] ss:$0 sm:$0xff] }
 0x1e5   :  { %1343 = vmatprep.subr.bf16.mxu1 %v1783_v0 }
 0x1e6   :  { %v547_v8 = vpop.f32.mrb[4].mxu0 }
 0x1e7   :  { %v1329_v9 = vpop.f32.mrb[5].mxu0 }
 0x1e8   :  { %1344 = vmatpush3.bf16.msra.mxu1 %v1475_v44  ;;  %v550_v10 = vpop.f32.mrb[6].mxu0 }
 0x1e9   :  { %1345 = vmatprep.subr.bf16.mxu1 %v1783_v0  ;;  %v1330_v11 = vpop.f32.mrb[7].mxu0 }
 0x1ec   :  { %1346 = vmatpush3.bf16.msra.mxu1 %v1477_v45 }
 0x1ed   :  { %1371 = vmatprep.subr.bf16.mxu1 %v1783_v0 }
 0x2a2   :  { %v423_v55 = vpop.f32.mrb[0].mxu1 }
 0x2a3   :  { %v424_v56 = vadd.f32 %v1138_v54, %v423_v55  ;;  %v1309_v57 = vpop.f32.mrb[1].mxu1 }
 0x2a4   :  { %v426_v58 = vpop.f32.mrb[2].mxu1 }
 0x2a5   :  { %v2119_v60 = vpack.c.bf16 %v424_v56, %v424_v56  ;;  %v1310_v61 = vpop.f32.mrb[3].mxu1  ;;  %v2130_v6 = vadd.f32 %v1138_v54, %v426_v58 }
 0x2a7   :  { %1348 = vmatmul.mubr.bf16.vlgmr.msra.gmra.mrb[4].mxu1 %v2119_v60  ;;  %v778_v7 = vpack.c.bf16 %v2130_v6, %v2130_v6 }
 0x2a8   :  { %1372 = vmatpush3.bf16.msra.mxu1 %v1478_v59  ;;  %1387 = vmatprep.mubr.msk.bf16.mxu1 %vm1784_vm0, %v1783_v0 }
 0x2a9   :  { %1373 = vmatprep.subr.bf16.mxu1 %v1783_v0 }
 0x2ac   :  { %1374 = vmatpush3.bf16.msra.mxu1 %v1479_v62 }
 0x2ad   :  { %1375 = vmatprep.subr.bf16.mxu1 %v1783_v0 }
 0x2b0   :  { %1376 = vmatpush3.bf16.msra.mxu1 %v1480_v63 }
 0x2b1   :  { %1377 = vmatprep.subr.bf16.mxu1 %v1783_v0 }
 0x2b4   :  { %1378 = vmatpush3.bf16.msra.mxu1 %v1481_v1 }
 0x2b5   :  { %1379 = vmatprep.subr.bf16.mxu1 %v1783_v0 }
 0x2b8   :  { %1380 = vmatpush3.bf16.msra.mxu1 %v1482_v2 }
 0x2b9   :  { %1381 = vmatprep.subr.bf16.mxu1 %v1783_v0 }
 0x2bc   :  { %1382 = vmatpush3.bf16.msra.mxu1 %v1483_v3  ;;  %v1190_v3 = vld [vmem:[%s2202_s30] ss:$0 sm:$0xff] }
 0x2bd   :  { %1383 = vmatprep.subr.bf16.mxu1 %v1783_v0 }
 0x2c0   :  { %1384 = vmatpush3.bf16.msra.mxu1 %v1484_v4 }
 0x2c1   :  { %1385 = vmatprep.subr.bf16.mxu1 %v1783_v0 }
 0x2c4   :  { %1386 = vmatpush3.bf16.msra.mxu1 %v1485_v5 }
 0x2c5   :  { %1411 = vmatprep.subr.bf16.mxu1 %v1783_v0 }
 0x2c7   :  { %1388 = vmatmul.mubr.bf16.vlgmr.msra.gmra.mrb[8].mxu1 %v778_v7 }
 0x2c8   :  { %1427 = vmatprep.mubr.msk.bf16.mxu1 %vm1784_vm0, %v1783_v0  ;;  %1412 = vmatpush3.bf16.msra.mxu1 %v1502_v35 }
 0x2c9   :  { %1413 = vmatprep.subr.bf16.mxu1 %v1783_v0 }
 0x2cc   :  { %1414 = vmatpush3.bf16.msra.mxu1 %v1503_v36 }
 0x2cd   :  { %1415 = vmatprep.subr.bf16.mxu1 %v1783_v0 }
 0x2d0   :  { %1416 = vmatpush3.bf16.msra.mxu1 %v1504_v37 }
 0x2d1   :  { %1417 = vmatprep.subr.bf16.mxu1 %v1783_v0 }
 0x2d4   :  { %1418 = vmatpush3.bf16.msra.mxu1 %v1505_v38 }
 0x2d5   :  { %1419 = vmatprep.subr.bf16.mxu1 %v1783_v0 }
 0x2d8   :  { %1420 = vmatpush3.bf16.msra.mxu1 %v1506_v39 }
 0x2d9   :  { %1421 = vmatprep.subr.bf16.mxu1 %v1783_v0 }
 0x2dc   :  { %1422 = vmatpush3.bf16.msra.mxu1 %v1507_v40 }
 0x2dd   :  { %1423 = vmatprep.subr.bf16.mxu1 %v1783_v0 }
 0x2e0   :  { %1424 = vmatpush3.bf16.msra.mxu1 %v1508_v41 }
 0x2e1   :  { %1425 = vmatprep.subr.bf16.mxu1 %v1783_v0 }
 0x2e4   :  { %1426 = vmatpush3.bf16.msra.mxu1 %v1509_v42 }
 0x37a   :  { %v635_v14 = vpop.f32.mrb[4].mxu1 }
 0x37b   :  { %v636_v16 = vadd.f32 %v635_v14, %v547_v8  ;;  %v1349_v17 = vpop.f32.mrb[5].mxu1 }
 0x37c   :  { %v638_v18 = vpop.f32.mrb[6].mxu1 }
 0x37d   :  { %v648_v19 = vadd.f32 %v1163_v15, %v636_v16  ;;  %v1350_v20 = vpop.f32.mrb[7].mxu1 }
 0x37f   :  { %v649_v21 = vmax.f32 %v648_v19, 0.0 }
 0x381   :  { %v650_v23 = vpack.c.bf16 %v649_v21, %v649_v21 }
 0x383   :  { %1368 = vmatmul.mubr.bf16.vlgmr.msra.gmra.mrb[8].mxu0 %v650_v23 }
 0x384   :  { %1392 = vmatpush3.bf16.msra.mxu0 %v1494_v22  ;;  %1407 = vmatprep.mubr.msk.bf16.mxu0 %vm1784_vm0, %v1783_v0 }
 0x385   :  { %1393 = vmatprep.subr.bf16.mxu0 %v1783_v0 }
 0x388   :  { %1394 = vmatpush3.bf16.msra.mxu0 %v1495_v24 }
 0x389   :  { %1395 = vmatprep.subr.bf16.mxu0 %v1783_v0 }
 0x38c   :  { %1396 = vmatpush3.bf16.msra.mxu0 %v1496_v25 }
 0x38d   :  { %1397 = vmatprep.subr.bf16.mxu0 %v1783_v0 }
 0x390   :  { %1398 = vmatpush3.bf16.msra.mxu0 %v1497_v26 }
 0x391   :  { %1399 = vmatprep.subr.bf16.mxu0 %v1783_v0 }
 0x394   :  { %1400 = vmatpush3.bf16.msra.mxu0 %v1498_v27 }
 0x395   :  { %1401 = vmatprep.subr.bf16.mxu0 %v1783_v0 }
 0x398   :  { %1402 = vmatpush3.bf16.msra.mxu0 %v1499_v28 }
 0x399   :  { %1403 = vmatprep.subr.bf16.mxu0 %v1783_v0 }
 0x39a   :  { %v877_v30 = vpop.f32.mrb[8].mxu1 }
 0x39b   :  { %v1389_v31 = vpop.f32.mrb[9].mxu1 }
 0x39c   :  { %v880_v32 = vpop.f32.mrb[10].mxu1  ;;  %1404 = vmatpush3.bf16.msra.mxu0 %v1500_v29 }
 0x39d   :  { %v1390_v34 = vpop.f32.mrb[11].mxu1  ;;  %1405 = vmatprep.subr.bf16.mxu0 %v1783_v0  ;;  %v1189_v0 = vld [vmem:[%s2192_s15] ss:$0 sm:$0xff] }
 0x3a0   :  { %1406 = vmatpush3.bf16.msra.mxu0 %v1501_v33 }
 0x3a3   :  { %1408 = vmatmul.mubr.bf16.vlgmr.msra.gmra.mrb[12].mxu0 %v2119_v60 }
 0x456   :  { %v756_v44 = vpop.f32.mrb[8].mxu0 }
 0x457   :  { %v757_v45 = vadd.f32 %v1164_v43, %v756_v44  ;;  %v1369_v47 = vpop.f32.mrb[9].mxu0 }
 0x458   :  { %v759_v48 = vpop.f32.mrb[10].mxu0 }
 0x459   :  { %v1370_v49 = vpop.f32.mrb[11].mxu0  ;;  %v1093_v50 = vsub.f32 %v2130_v6, %v757_v45 }
 0x45b   :  { %v1095_v51 = vmul.f32 %v1093_v50, %v1093_v50 }
 0x45d   :  { %1096 = vadd.xlane.f32.xlu0 %v1095_v51 }
 0x476   :  { %v965_v52 = vpop.f32.mrb[12].mxu0 }
 0x477   :  { %v966_v53 = vadd.f32 %v965_v52, %v877_v30  ;;  %v1409_v54 = vpop.f32.mrb[13].mxu0 }
 0x478   :  { %v968_v55 = vpop.f32.mrb[14].mxu0 }
 0x479   :  { %v978_v56 = vadd.f32 %v1189_v0, %v966_v53  ;;  %v1410_v57 = vpop.f32.mrb[15].mxu0 }
 0x47b   :  { %v979_v58 = vmax.f32 %v978_v56, 0.0 }
 0x47d   :  { %v980_v59 = vpack.c.bf16 %v979_v58, %v979_v58 }
 0x47f   :  { %1428 = vmatmul.mubr.bf16.vlgmr.msra.gmra.mrb[12].mxu1 %v980_v59 }
 0x4ea   :  { %v1097_v60 = vpop.xlane.xlu0 %1096 }
 0x4eb   :  { %1510 = vrsqrt.f32 %v1097_v60  ;;  %vm1100_vm2 = vcmp.eq.f32.partialorder %v1097_v60, inf  ;;  %v1103_v63 = vand.u32 2147483648, %v1097_v60  ;;  %vm1102_vm3 = vcmp.eq.f32.partialorder %v1097_v60, 0.0 }
 0x4f5   :  { %v1511_v61 = vpop.eup %1510 }
 0x4f6   :  { %v1099_v62 = vmul.f32 %v1511_v61, %v1097_v60 }
 0x4f8   :  { %v1101_v1 = vsel %vm1100_vm2, %v1097_v60, %v1099_v62 }
 0x4f9   :  { %v1104_v2 = vsel %vm1102_vm3, %v1103_v63, %v1101_v1 }
 0x4fa   :  { %1106 = vst.msk [vmem:[%s2194_s17] sm:$0xff] %vm1105_vm1, %v1104_v2 }
 0x552   :  { %v1086_v4 = vpop.f32.mrb[12].mxu1 }
 0x553   :  { %v1087_v5 = vadd.f32 %v1190_v3, %v1086_v4  ;;  %v1429_v6 = vpop.f32.mrb[13].mxu1 }
 0x554   :  { %v1089_v7 = vpop.f32.mrb[14].mxu1 }
 0x555   :  { %1512 = vtanh.f32 %v1087_v5  ;;  %v1430_v8 = vpop.f32.mrb[15].mxu1 }
 0x55f   :  { %v1513_v9 = vpop.eup %1512 }
 0x560   :  { %v1094_v10 = vsub.f32 %v2103_v46, %v1513_v9 }
 0x562   :  { %v1107_v11 = vmul.f32 %v1094_v10, %v1094_v10 }
 0x564   :  { %1108 = vadd.xlane.f32.xlu0 %v1107_v11 }
 0x5f1   :  { %v1109_v12 = vpop.xlane.xlu0 %1108 }
 0x5f2   :  { %1514 = vrsqrt.f32 %v1109_v12  ;;  %vm1112_vm5 = vcmp.eq.f32.partialorder %v1109_v12, inf  ;;  %v1115_v15 = vand.u32 2147483648, %v1109_v12  ;;  %vm1114_vm6 = vcmp.eq.f32.partialorder %v1109_v12, 0.0 }
 0x5fc   :  { %v1515_v13 = vpop.eup %1514 }
 0x5fd   :  { %v1111_v14 = vmul.f32 %v1515_v13, %v1109_v12 }
 0x5ff   :  { %v1113_v16 = vsel %vm1112_vm5, %v1109_v12, %v1111_v14 }
 0x600   :  { %v1116_v17 = vsel %vm1114_vm6, %v1115_v15, %v1113_v16 }
 0x601   :  { %1118 = vst.msk [vmem:[%s2194_s17] sm:$0xff] %vm1117_vm4, %v1116_v17 }
 0x602   :  { %1123 = vsyncpa [#allocation3], 1 }
 0x603   :  { %1124 = vsyncpa [#allocation5], 1 }
 0x604   :  { %1125 = vsyncpa [#allocation8], 1 }
 0x605   :  { %1126 = vsyncpa [#allocation11], 1 }
 0x606   :  { %1127 = vsyncpa [#allocation14], 1 }
 0x607   :  { %1128 = vsyncpa [#allocation17], 1 }

// kernel: tpu_custom_call.1
= control target key start
LH: loop header
LB: loop body
LE: loop exit
PB: predicated region body
PF: predicated region fallthrough
CT: control target
= control target key end

     0   :  { %s2177_s0 = inlined_call_operand.hbm [shape: f32[8,128], index: 0, kind: input, shape index: {}]   ;;  %s2178_s1 = inlined_call_operand.hbm [shape: f32[8,128], index: 1, kind: input, shape index: {}]   ;;  %s2179_s2 = inlined_call_operand.hbm [shape: f32[8,128], index: 2, kind: input, shape index: {}]   ;;  %s2180_s3 = inlined_call_operand.hbm [shape: bf16[128,128], index: 3, kind: input, shape index: {}]   ;;  %s2181_s4 = inlined_call_operand.hbm [shape: bf16[128,128], index: 4, kind: input, shape index: {}]   ;;  %s2182_s5 = inlined_call_operand.hbm [shape: bf16[128,128], index: 5, kind: input, shape index: {}]   ;;  %s2183_s6 = inlined_call_operand.hbm [shape: bf16[128,128], index: 6, kind: input, shape index: {}]   ;;  %s2184_s7 = inlined_call_operand.hbm [shape: bf16[128,128], index: 7, kind: input, shape index: {}]   ;;  %s2185_s8 = inlined_call_operand.hbm [shape: bf16[128,128], index: 8, kind: input, shape index: {}]   ;;  %s2186_s9 = inlined_call_operand.hbm [shape: bf16[128,128], index: 9, kind: input, shape index: {}]   ;;  %s2187_s10 = inlined_call_operand.hbm [shape: bf16[128,128], index: 10, kind: input, shape index: {}]   ;;  %s2188_s11 = inlined_call_operand.vmem [shape: f32[1,128], index: 11, kind: input, shape index: {}]   ;;  %s2189_s12 = inlined_call_operand.vmem [shape: f32[1,128], index: 12, kind: input, shape index: {}]   ;;  %s2190_s13 = inlined_call_operand.vmem [shape: f32[1,128], index: 13, kind: input, shape index: {}]   ;;  %s2191_s14 = inlined_call_operand.vmem [shape: f32[1,128], index: 14, kind: input, shape index: {}]   ;;  %s2192_s15 = inlined_call_operand.vmem [shape: f32[1,128], index: 15, kind: input, shape index: {}]   ;;  %s2193_s16 = inlined_call_operand.vmem [shape: f32[1,128], index: 16, kind: input, shape index: {}]   ;;  %s2194_s17 = inlined_call_operand.vmem [shape: f32[8,2], index: 17, kind: output, shape index: {}]  }
   0x1   :  { %2197 = sst [smem:[#allocation25_spill]] %s2177_s0 }
   0x2   :  { %2198 = sst [smem:[#allocation26_spill]] %s2178_s1 }
   0x3   :  { %2199 = sst [smem:[#allocation27_spill]] %s2193_s16 }
   0x4   :  { %22 = vsyncpa [#allocation3], 0 }
   0x5   :  { %23 = vsyncpa [#allocation5], 0 }
   0x6   :  { %24 = vsyncpa [#allocation8], 0 }
   0x7   :  { %25 = vsyncpa [#allocation11], 0 }
   0x8   :  { %26 = vsyncpa [#allocation14], 0 }
   0x9   :  { %27 = vsyncpa [#allocation17], 0  ;;  %s1770_s24 = smov [#allocation4]   ;;  %s1771_s26 = smov [#allocation7]  }
   0xa   :  { %s44_s25 = sshll.u32 %s1770_s24, 4  ;;  %s63_s27 = sshll.u32 %s1771_s26, 4  ;;  %s45_s25 = int_to_ptr.vmem [resolvable:$true] %s44_s25  ;;  %s1875_s27 = int_to_ptr.vmem [resolvable:$true] %s63_s27 }
   0xb   :  { %s2200_s0 = sld [smem:[#allocation26_spill]] }
  0x11   :  { %s1516_s30 = scalar_lea.hbm %s2200_s0, 128 }
  0x12   :  { %p1517_p0 = scmp.ne.s32.totalorder %s2200_s0, %s1516_s30  ;;  %p1520_p1 = scmp.lt.u32.totalorder %s1516_s30, %s2200_s0 }
  0x14   :  { %p1522_p2 = pnand %p1520_p1, %p1517_p0 }
  0x16   :  { %1525 = shalt.err (!%p1522_p2)
}
  0x17   :  { %s1526_s21 = scalar_lea.vmem %s45_s25, 128  ;;  %p1531_p4 = scmp.lt.s32.totalorder %s45_s25, %s45_s25 }
  0x18   :  { %p1527_p3 = scmp.ne.s32.totalorder %s45_s25, %s1526_s21  ;;  %p1532_p5 = scmp.lt.s32.totalorder %s1526_s21, %s1526_s21 }
  0x1a   :  { %p1533_p6 = por %p1532_p5, %p1531_p4 }
  0x1c   :  { %p1534_p7 = pnand %p1533_p6, %p1527_p3 }
  0x1e   :  { %1537 = shalt.err (!%p1534_p7)
}
  0x1f   :  { %47 = dma.hbm_to_vmem [thread:$0]  %s2200_s0, 128, %s45_s25, [#allocation5]  }
  0x20   :  { %s1538_s28 = scalar_lea.hbm %s2180_s3, 1024 }
  0x21   :  { %p1539_p8 = scmp.ne.s32.totalorder %s2180_s3, %s1538_s28  ;;  %p1542_p9 = scmp.lt.u32.totalorder %s1538_s28, %s2180_s3 }
  0x23   :  { %p1544_p10 = pnand %p1542_p9, %p1539_p8 }
  0x25   :  { %1547 = shalt.err (!%p1544_p10)
}
  0x26   :  { %s1548_s1 = scalar_lea.vmem %s1875_s27, 1024  ;;  %p1553_p12 = scmp.lt.s32.totalorder %s1875_s27, %s1875_s27 }
  0x27   :  { %p1549_p11 = scmp.ne.s32.totalorder %s1875_s27, %s1548_s1  ;;  %p1554_p13 = scmp.lt.s32.totalorder %s1548_s1, %s1548_s1 }
  0x29   :  { %p1555_p0 = por %p1554_p13, %p1553_p12 }
  0x2b   :  { %p1556_p1 = pnand %p1555_p0, %p1549_p11 }
  0x2d   :  { %1559 = shalt.err (!%p1556_p1)
}
  0x2e   :  { %s1772_s25 = smov 64   ;;  %s1773_s0 = smov 4  }
  0x2f   :  { %69 = dma.hbm_to_vmem [thread:$0]  %s2180_s3, 1024, %s1875_s27, [#allocation8], %s1772_s25, %s1772_s25, %s1773_s0  }
  0x30   :  { %s1774_s22 = smov [#allocation10]   ;;  %s1775_s24 = smov [#allocation13]  }
  0x31   :  { %s87_s23 = sshll.u32 %s1774_s22, 4  ;;  %s111_s26 = sshll.u32 %s1775_s24, 4  ;;  %s88_s23 = int_to_ptr.vmem [resolvable:$true] %s87_s23  ;;  %s1909_s26 = int_to_ptr.vmem [resolvable:$true] %s111_s26 }
  0x32   :  { %s1560_s18 = scalar_lea.hbm %s2182_s5, 1024 }
  0x33   :  { %p1561_p2 = scmp.ne.s32.totalorder %s2182_s5, %s1560_s18  ;;  %p1564_p3 = scmp.lt.u32.totalorder %s1560_s18, %s2182_s5 }
  0x35   :  { %p1566_p4 = pnand %p1564_p3, %p1561_p2 }
  0x37   :  { %1569 = shalt.err (!%p1566_p4)
}
  0x38   :  { %s1570_s3 = scalar_lea.vmem %s88_s23, 1024  ;;  %p1575_p6 = scmp.lt.s32.totalorder %s88_s23, %s88_s23 }
  0x39   :  { %p1571_p5 = scmp.ne.s32.totalorder %s88_s23, %s1570_s3  ;;  %p1576_p7 = scmp.lt.s32.totalorder %s1570_s3, %s1570_s3 }
  0x3b   :  { %p1577_p8 = por %p1576_p7, %p1575_p6 }
  0x3d   :  { %p1578_p9 = pnand %p1577_p8, %p1571_p5 }
  0x3f   :  { %1581 = shalt.err (!%p1578_p9)
}
  0x40   :  { %93 = dma.hbm_to_vmem [thread:$0]  %s2182_s5, 1024, %s88_s23, [#allocation11], %s1772_s25, %s1772_s25, %s1773_s0  }
  0x41   :  { %s1582_s16 = scalar_lea.hbm %s2184_s7, 1024 }
  0x42   :  { %p1583_p10 = scmp.ne.s32.totalorder %s2184_s7, %s1582_s16  ;;  %p1586_p11 = scmp.lt.u32.totalorder %s1582_s16, %s2184_s7 }
  0x44   :  { %p1588_p12 = pnand %p1586_p11, %p1583_p10 }
  0x46   :  { %1591 = shalt.err (!%p1588_p12)
}
  0x47   :  { %s1592_s30 = scalar_lea.vmem %s1909_s26, 1024  ;;  %p1597_p0 = scmp.lt.s32.totalorder %s1909_s26, %s1909_s26 }
  0x48   :  { %p1593_p13 = scmp.ne.s32.totalorder %s1909_s26, %s1592_s30  ;;  %p1598_p1 = scmp.lt.s32.totalorder %s1592_s30, %s1592_s30 }
  0x4a   :  { %p1599_p2 = por %p1598_p1, %p1597_p0 }
  0x4c   :  { %p1600_p3 = pnand %p1599_p2, %p1593_p13 }
  0x4e   :  { %1603 = shalt.err (!%p1600_p3)
}
  0x4f   :  { %117 = dma.hbm_to_vmem [thread:$0]  %s2184_s7, 1024, %s1909_s26, [#allocation14], %s1772_s25, %s1772_s25, %s1773_s0  }
  0x50   :  { %s1776_s19 = smov [#allocation16]   ;;  %s1777_s3 = smov [#allocation2]  }
  0x51   :  { %s135_s1 = sshll.u32 %s1776_s19, 4  ;;  %s34_s27 = sshll.u32 %s1777_s3, 4  ;;  %s136_s1 = int_to_ptr.vmem [resolvable:$true] %s135_s1  ;;  %s35_s27 = int_to_ptr.vmem [resolvable:$true] %s34_s27 }
  0x52   :  { %s1604_s22 = scalar_lea.hbm %s2186_s9, 1024 }
  0x53   :  { %p1605_p4 = scmp.ne.s32.totalorder %s2186_s9, %s1604_s22  ;;  %p1608_p5 = scmp.lt.u32.totalorder %s1604_s22, %s2186_s9 }
  0x55   :  { %p1610_p6 = pnand %p1608_p5, %p1605_p4 }
  0x57   :  { %1613 = shalt.err (!%p1610_p6)
}
  0x58   :  { %s1614_s7 = scalar_lea.vmem %s136_s1, 1024  ;;  %p1619_p8 = scmp.lt.s32.totalorder %s136_s1, %s136_s1 }
  0x59   :  { %p1615_p7 = scmp.ne.s32.totalorder %s136_s1, %s1614_s7  ;;  %p1620_p9 = scmp.lt.s32.totalorder %s1614_s7, %s1614_s7 }
  0x5b   :  { %p1621_p10 = por %p1620_p9, %p1619_p8 }
  0x5d   :  { %p1622_p11 = pnand %p1621_p10, %p1615_p7 }
  0x5f   :  { %1625 = shalt.err (!%p1622_p11)
}
  0x60   :  { %141 = dma.hbm_to_vmem [thread:$0]  %s2186_s9, 1024, %s136_s1, [#allocation17], %s1772_s25, %s1772_s25, %s1773_s0  }
  0x61   :  { %s2201_s23 = sld [smem:[#allocation25_spill]] }
  0x67   :  { %s1626_s19 = scalar_lea.hbm %s2201_s23, 128 }
  0x68   :  { %p1627_p12 = scmp.ne.s32.totalorder %s2201_s23, %s1626_s19  ;;  %p1630_p13 = scmp.lt.u32.totalorder %s1626_s19, %s2201_s23 }
  0x6a   :  { %p1632_p0 = pnand %p1630_p13, %p1627_p12 }
  0x6c   :  { %1635 = shalt.err (!%p1632_p0)
}
  0x6d   :  { %s1636_s16 = scalar_lea.vmem %s35_s27, 128  ;;  %p1641_p2 = scmp.lt.s32.totalorder %s35_s27, %s35_s27 }
  0x6e   :  { %p1637_p1 = scmp.ne.s32.totalorder %s35_s27, %s1636_s16  ;;  %p1642_p3 = scmp.lt.s32.totalorder %s1636_s16, %s1636_s16 }
  0x70   :  { %p1643_p4 = por %p1642_p3, %p1641_p2 }
  0x72   :  { %p1644_p5 = pnand %p1643_p4, %p1637_p1 }
  0x74   :  { %1647 = shalt.err (!%p1644_p5)
}
  0x75   :  { %37 = dma.hbm_to_vmem [thread:$0]  %s2201_s23, 128, %s35_s27, [#allocation3]  }
  0x76   :  { %s1778_s24 = smov [#allocation6]   ;;  %s1779_s29 = smov [#allocation9]  }
  0x77   :  { %s54_s28 = sshll.u32 %s1778_s24, 4  ;;  %s75_s7 = sshll.u32 %s1779_s29, 4  ;;  %s55_s28 = int_to_ptr.vmem [resolvable:$true] %s54_s28  ;;  %s1973_s7 = int_to_ptr.vmem [resolvable:$true] %s75_s7 }
  0x78   :  { %s1648_s30 = scalar_lea.hbm %s2179_s2, 128 }
  0x79   :  { %p1649_p6 = scmp.ne.s32.totalorder %s2179_s2, %s1648_s30  ;;  %p1652_p7 = scmp.lt.u32.totalorder %s1648_s30, %s2179_s2 }
  0x7b   :  { %p1654_p8 = pnand %p1652_p7, %p1649_p6 }
  0x7d   :  { %1657 = shalt.err (!%p1654_p8)
}
  0x7e   :  { %s1658_s27 = scalar_lea.vmem %s55_s28, 128  ;;  %p1663_p10 = scmp.lt.s32.totalorder %s55_s28, %s55_s28 }
  0x7f   :  { %p1659_p9 = scmp.ne.s32.totalorder %s55_s28, %s1658_s27  ;;  %p1664_p11 = scmp.lt.s32.totalorder %s1658_s27, %s1658_s27 }
  0x81   :  { %p1665_p12 = por %p1664_p11, %p1663_p10 }
  0x83   :  { %p1666_p13 = pnand %p1665_p12, %p1659_p9 }
  0x85   :  { %1669 = shalt.err (!%p1666_p13)
}
  0x86   :  { %57 = dma.hbm_to_vmem [thread:$0]  %s2179_s2, 128, %s55_s28, [#allocation5]  }
  0x87   :  { %s1670_s9 = scalar_lea.hbm %s2181_s4, 1024 }
  0x88   :  { %p1671_p0 = scmp.ne.s32.totalorder %s2181_s4, %s1670_s9  ;;  %p1674_p1 = scmp.lt.u32.totalorder %s1670_s9, %s2181_s4 }
  0x8a   :  { %p1676_p2 = pnand %p1674_p1, %p1671_p0 }
  0x8c   :  { %1679 = shalt.err (!%p1676_p2)
}
  0x8d   :  { %s1680_s18 = scalar_lea.vmem %s1973_s7, 1024  ;;  %p1685_p4 = scmp.lt.s32.totalorder %s1973_s7, %s1973_s7 }
  0x8e   :  { %p1681_p3 = scmp.ne.s32.totalorder %s1973_s7, %s1680_s18  ;;  %p1686_p5 = scmp.lt.s32.totalorder %s1680_s18, %s1680_s18 }
  0x90   :  { %p1687_p6 = por %p1686_p5, %p1685_p4 }
  0x92   :  { %p1688_p7 = pnand %p1687_p6, %p1681_p3 }
  0x94   :  { %1691 = shalt.err (!%p1688_p7)
}
  0x95   :  { %81 = dma.hbm_to_vmem [thread:$0]  %s2181_s4, 1024, %s1973_s7, [#allocation8], %s1772_s25, %s1772_s25, %s1773_s0  }
  0x96   :  { %s1780_s30 = smov [#allocation12]   ;;  %s1781_s19 = smov [#allocation15]  }
  0x97   :  { %s99_s5 = sshll.u32 %s1780_s30, 4  ;;  %s123_s3 = sshll.u32 %s1781_s19, 4  ;;  %s100_s5 = int_to_ptr.vmem [resolvable:$true] %s99_s5  ;;  %s2007_s3 = int_to_ptr.vmem [resolvable:$true] %s123_s3 }
  0x98   :  { %s1692_s23 = scalar_lea.hbm %s2183_s6, 1024 }
  0x99   :  { %p1693_p8 = scmp.ne.s32.totalorder %s2183_s6, %s1692_s23  ;;  %p1696_p9 = scmp.lt.u32.totalorder %s1692_s23, %s2183_s6 }
  0x9b   :  { %p1698_p10 = pnand %p1696_p9, %p1693_p8 }
  0x9d   :  { %1701 = shalt.err (!%p1698_p10)
}
  0x9e   :  { %s1702_s4 = scalar_lea.vmem %s100_s5, 1024  ;;  %p1707_p12 = scmp.lt.s32.totalorder %s100_s5, %s100_s5 }
  0x9f   :  { %p1703_p11 = scmp.ne.s32.totalorder %s100_s5, %s1702_s4  ;;  %p1708_p13 = scmp.lt.s32.totalorder %s1702_s4, %s1702_s4 }
  0xa1   :  { %p1709_p0 = por %p1708_p13, %p1707_p12 }
  0xa3   :  { %p1710_p1 = pnand %p1709_p0, %p1703_p11 }
  0xa5   :  { %1713 = shalt.err (!%p1710_p1)
}
  0xa6   :  { %105 = dma.hbm_to_vmem [thread:$0]  %s2183_s6, 1024, %s100_s5, [#allocation11], %s1772_s25, %s1772_s25, %s1773_s0  }
  0xa7   :  { %s1714_s26 = scalar_lea.hbm %s2185_s8, 1024 }
  0xa8   :  { %p1715_p2 = scmp.ne.s32.totalorder %s2185_s8, %s1714_s26  ;;  %p1718_p3 = scmp.lt.u32.totalorder %s1714_s26, %s2185_s8 }
  0xaa   :  { %p1720_p4 = pnand %p1718_p3, %p1715_p2 }
  0xac   :  { %1723 = shalt.err (!%p1720_p4)
}
  0xad   :  { %s1724_s19 = scalar_lea.vmem %s2007_s3, 1024  ;;  %p1729_p6 = scmp.lt.s32.totalorder %s2007_s3, %s2007_s3 }
  0xae   :  { %p1725_p5 = scmp.ne.s32.totalorder %s2007_s3, %s1724_s19  ;;  %p1730_p7 = scmp.lt.s32.totalorder %s1724_s19, %s1724_s19 }
  0xb0   :  { %p1731_p8 = por %p1730_p7, %p1729_p6 }
  0xb2   :  { %p1732_p9 = pnand %p1731_p8, %p1725_p5 }
  0xb4   :  { %1735 = shalt.err (!%p1732_p9)
}
  0xb5   :  { %129 = dma.hbm_to_vmem [thread:$0]  %s2185_s8, 1024, %s2007_s3, [#allocation14], %s1772_s25, %s1772_s25, %s1773_s0  }
  0xb6   :  { %s1782_s20 = smov [#allocation18]   ;;  %s1736_s22 = scalar_lea.hbm %s2187_s10, 1024 }
  0xb7   :  { %s147_s27 = sshll.u32 %s1782_s20, 4  ;;  %p1737_p10 = scmp.ne.s32.totalorder %s2187_s10, %s1736_s22  ;;  %s148_s27 = int_to_ptr.vmem [resolvable:$true] %s147_s27 }
  0xb8   :  { %p1740_p11 = scmp.lt.u32.totalorder %s1736_s22, %s2187_s10 }
  0xba   :  { %p1742_p12 = pnand %p1740_p11, %p1737_p10 }
  0xbc   :  { %1745 = shalt.err (!%p1742_p12)
}
  0xbd   :  { %s1746_s1 = scalar_lea.vmem %s148_s27, 1024  ;;  %p1751_p0 = scmp.lt.s32.totalorder %s148_s27, %s148_s27 }
  0xbe   :  { %p1747_p13 = scmp.ne.s32.totalorder %s148_s27, %s1746_s1  ;;  %p1752_p1 = scmp.lt.s32.totalorder %s1746_s1, %s1746_s1 }
  0xc0   :  { %p1753_p2 = por %p1752_p1, %p1751_p0 }
  0xc2   :  { %p1754_p3 = pnand %p1753_p2, %p1747_p13 }
  0xc4   :  { %1757 = shalt.err (!%p1754_p3)
}
  0xc5   :  { %153 = dma.hbm_to_vmem [thread:$0]  %s2187_s10, 1024, %s148_s27, [#allocation17], %s1772_s25, %s1772_s25, %s1773_s0  }
  0xc6   :  { %1758 = dma.done.wait [#allocation3], 128  }
  0xc7   :  { %1759 = vsyncadd [#allocation3], 4294967168 }
  0xc8   :  { %1760 = dma.done.wait [#allocation5], 256  }
  0xc9   :  { %1761 = vsyncadd [#allocation5], 4294967040 }
  0xca   :  { %1762 = dma.done.wait [#allocation8], 2048  }
  0xcb   :  { %1763 = vsyncadd [#allocation8], 4294965248 }
  0xcc   :  { %1764 = dma.done.wait [#allocation11], 2048  }
  0xcd   :  { %1765 = vsyncadd [#allocation11], 4294965248 }
  0xce   :  { %1766 = dma.done.wait [#allocation14], 2048  }
  0xcf   :  { %1767 = vsyncadd [#allocation14], 4294965248 }
  0xd0   :  { %1768 = dma.done.wait [#allocation17], 2048  }
  0xd1   :  { %1769 = vsyncadd [#allocation17], 4294965248  ;;  %v1783_v0 = vmov 0.0   ;;  %vm1784_vm0 = vmmov 0   ;;  %v1446_v1 = vld [vmem:[#allocation7] sm:$0xff]   ;;  %v1447_v2 = vld [vmem:[#allocation7 + $0x8] sm:$0xff]  }
  0xd2   :  { %1271 = vmatprep.subr.bf16.mxu0 %v1783_v0  ;;  %1287 = vmatprep.mubr.msk.bf16.mxu0 %vm1784_vm0, %v1783_v0  ;;  %v1448_v3 = vld [vmem:[#allocation7 + $0x10] sm:$0xff]   ;;  %v1454_v4 = vld [vmem:[#allocation9] sm:$0xff]   ;;  %v1449_v5 = vld [vmem:[#allocation7 + $0x18] sm:$0xff]   ;;  %vm1105_vm1 = vcmask 7168   ;;  %s2202_s30 = sld [smem:[#allocation27_spill]]  ;;  %vm1117_vm4 = vcmask 15368  }
  0xd3   :  { %1291 = vmatprep.subr.bf16.mxu1 %v1783_v0  ;;  %1307 = vmatprep.mubr.msk.bf16.mxu1 %vm1784_vm0, %v1783_v0  ;;  %v1455_v6 = vld [vmem:[#allocation9 + $0x8] sm:$0xff]   ;;  %v1450_v7 = vld [vmem:[#allocation7 + $0x20] sm:$0xff]   ;;  %v1456_v8 = vld [vmem:[#allocation9 + $0x10] sm:$0xff]  }
  0xd4   :  { %1272 = vmatpush3.bf16.msra.mxu0 %v1446_v1  ;;  %1292 = vmatpush3.bf16.msra.mxu1 %v1454_v4  ;;  %v1451_v9 = vld [vmem:[#allocation7 + $0x28] sm:$0xff]   ;;  %v1457_v10 = vld [vmem:[#allocation9 + $0x18] sm:$0xff]   ;;  %v1452_v11 = vld [vmem:[#allocation7 + $0x30] sm:$0xff]  }
  0xd5   :  { %1273 = vmatprep.subr.bf16.mxu0 %v1783_v0  ;;  %1293 = vmatprep.subr.bf16.mxu1 %v1783_v0  ;;  %v1458_v12 = vld [vmem:[#allocation9 + $0x20] sm:$0xff]   ;;  %v1453_v13 = vld [vmem:[#allocation7 + $0x38] sm:$0xff]   ;;  %v200_v14 = vld [vmem:[#allocation2] sm:$0xff] }
  0xd6   :  { %v201_v15 = vld [vmem:[#allocation6] sm:$0xff]  ;;  %v1459_v16 = vld [vmem:[#allocation9 + $0x28] sm:$0xff]   ;;  %v1460_v18 = vld [vmem:[#allocation9 + $0x30] sm:$0xff]  }
  0xd7   :  { %v202_v17 = vpack.c.bf16 %v201_v15, %v200_v14  ;;  %v1461_v19 = vld [vmem:[#allocation9 + $0x38] sm:$0xff]   ;;  %v1462_v20 = vld [vmem:[#allocation12] sm:$0xff]   ;;  %v1464_v21 = vld [vmem:[#allocation12 + $0x8] sm:$0xff]  }
  0xd8   :  { %1274 = vmatpush3.bf16.msra.mxu0 %v1447_v2  ;;  %1294 = vmatpush3.bf16.msra.mxu1 %v1455_v6  ;;  %v1466_v22 = vld [vmem:[#allocation12 + $0x10] sm:$0xff]   ;;  %v1468_v23 = vld [vmem:[#allocation12 + $0x18] sm:$0xff]   ;;  %v1470_v24 = vld [vmem:[#allocation12 + $0x20] sm:$0xff]  }
  0xd9   :  { %1275 = vmatprep.subr.bf16.mxu0 %v1783_v0  ;;  %1295 = vmatprep.subr.bf16.mxu1 %v1783_v0  ;;  %v1472_v25 = vld [vmem:[#allocation12 + $0x28] sm:$0xff]   ;;  %v1474_v26 = vld [vmem:[#allocation12 + $0x30] sm:$0xff]   ;;  %v1476_v27 = vld [vmem:[#allocation12 + $0x38] sm:$0xff]  }
  0xda   :  { %v1129_v28 = vld [vmem:[%s2188_s11] ss:$0 sm:$0xff]  ;;  %v1463_v37 = vld [vmem:[#allocation10] sm:$0xff]   ;;  %v1467_v40 = vld [vmem:[#allocation10 + $0x10] sm:$0xff]  }
  0xdb   :  { %v1465_v39 = vld [vmem:[#allocation10 + $0x8] sm:$0xff]   ;;  %v1469_v41 = vld [vmem:[#allocation10 + $0x18] sm:$0xff]   ;;  %v1471_v42 = vld [vmem:[#allocation10 + $0x20] sm:$0xff]  }
  0xdc   :  { %1276 = vmatpush3.bf16.msra.mxu0 %v1448_v3  ;;  %1296 = vmatpush3.bf16.msra.mxu1 %v1456_v8  ;;  %v1473_v43 = vld [vmem:[#allocation10 + $0x28] sm:$0xff]   ;;  %v1475_v44 = vld [vmem:[#allocation10 + $0x30] sm:$0xff]   ;;  %v1477_v45 = vld [vmem:[#allocation10 + $0x38] sm:$0xff]  }
  0xdd   :  { %1277 = vmatprep.subr.bf16.mxu0 %v1783_v0  ;;  %1297 = vmatprep.subr.bf16.mxu1 %v1783_v0  ;;  %v2103_v46 = vld [vmem:[#allocation4] sm:$0xff]  ;;  %v1486_v48 = vld [vmem:[#allocation13] sm:$0xff]   ;;  %v1487_v49 = vld [vmem:[#allocation13 + $0x8] sm:$0xff]  }
  0xde   :  { %v448_v47 = vpack.c.bf16 %v2103_v46, %v2103_v46  ;;  %v1488_v50 = vld [vmem:[#allocation13 + $0x10] sm:$0xff]   ;;  %v1489_v51 = vld [vmem:[#allocation13 + $0x18] sm:$0xff]   ;;  %v1490_v52 = vld [vmem:[#allocation13 + $0x20] sm:$0xff]  }
  0xdf   :  { %v1491_v53 = vld [vmem:[#allocation13 + $0x28] sm:$0xff]   ;;  %v1478_v59 = vld [vmem:[#allocation16] sm:$0xff]   ;;  %v1480_v63 = vld [vmem:[#allocation16 + $0x10] sm:$0xff]  }
  0xe0   :  { %1278 = vmatpush3.bf16.msra.mxu0 %v1449_v5  ;;  %1298 = vmatpush3.bf16.msra.mxu1 %v1457_v10  ;;  %v1138_v54 = vld [vmem:[%s2189_s12] ss:$0 sm:$0xff]  ;;  %v1481_v1 = vld [vmem:[#allocation16 + $0x18] sm:$0xff]   ;;  %v1482_v2 = vld [vmem:[#allocation16 + $0x20] sm:$0xff]  }
  0xe1   :  { %1279 = vmatprep.subr.bf16.mxu0 %v1783_v0  ;;  %1299 = vmatprep.subr.bf16.mxu1 %v1783_v0  ;;  %v1479_v62 = vld [vmem:[#allocation16 + $0x8] sm:$0xff]   ;;  %v1484_v4 = vld [vmem:[#allocation16 + $0x30] sm:$0xff]   ;;  %v1485_v5 = vld [vmem:[#allocation16 + $0x38] sm:$0xff]  }
  0xe2   :  { %v1483_v3 = vld [vmem:[#allocation16 + $0x28] sm:$0xff]  }
  0xe3   :  { %v1163_v15 = vld [vmem:[%s2190_s13] ss:$0 sm:$0xff] }
  0xe4   :  { %1280 = vmatpush3.bf16.msra.mxu0 %v1450_v7  ;;  %1300 = vmatpush3.bf16.msra.mxu1 %v1458_v12  ;;  %v1492_v12 = vld [vmem:[#allocation13 + $0x30] sm:$0xff]  }
  0xe5   :  { %1281 = vmatprep.subr.bf16.mxu0 %v1783_v0  ;;  %1301 = vmatprep.subr.bf16.mxu1 %v1783_v0 }
  0xe8   :  { %1282 = vmatpush3.bf16.msra.mxu0 %v1451_v9  ;;  %1302 = vmatpush3.bf16.msra.mxu1 %v1459_v16 }
  0xe9   :  { %1283 = vmatprep.subr.bf16.mxu0 %v1783_v0  ;;  %1303 = vmatprep.subr.bf16.mxu1 %v1783_v0 }
  0xec   :  { %1284 = vmatpush3.bf16.msra.mxu0 %v1452_v11  ;;  %1304 = vmatpush3.bf16.msra.mxu1 %v1460_v18 }
  0xed   :  { %1285 = vmatprep.subr.bf16.mxu0 %v1783_v0  ;;  %1305 = vmatprep.subr.bf16.mxu1 %v1783_v0 }
  0xf0   :  { %1286 = vmatpush3.bf16.msra.mxu0 %v1453_v13  ;;  %1306 = vmatpush3.bf16.msra.mxu1 %v1461_v19  ;;  %v1493_v13 = vld [vmem:[#allocation13 + $0x38] sm:$0xff]  }
  0xf1   :  { %1311 = vmatprep.subr.bf16.mxu0 %v1783_v0  ;;  %1331 = vmatprep.subr.bf16.mxu1 %v1783_v0 }
  0xf3   :  { %1288 = vmatmul.mubr.bf16.vlgmr.msra.gmra.mrb[0].mxu0 %v202_v17 }
  0xf4   :  { %1327 = vmatprep.mubr.msk.bf16.mxu0 %vm1784_vm0, %v1783_v0  ;;  %1312 = vmatpush3.bf16.msra.mxu0 %v1462_v20 }
  0xf5   :  { %1313 = vmatprep.subr.bf16.mxu0 %v1783_v0 }
  0xf8   :  { %1314 = vmatpush3.bf16.msra.mxu0 %v1464_v21 }
  0xf9   :  { %1315 = vmatprep.subr.bf16.mxu0 %v1783_v0 }
  0xfc   :  { %1316 = vmatpush3.bf16.msra.mxu0 %v1466_v22  ;;  %v1494_v22 = vld [vmem:[#allocation15] sm:$0xff]  }
  0xfd   :  { %1317 = vmatprep.subr.bf16.mxu0 %v1783_v0 }
 0x100   :  { %1318 = vmatpush3.bf16.msra.mxu0 %v1468_v23 }
 0x101   :  { %1319 = vmatprep.subr.bf16.mxu0 %v1783_v0 }
 0x104   :  { %1320 = vmatpush3.bf16.msra.mxu0 %v1470_v24  ;;  %v1495_v24 = vld [vmem:[#allocation15 + $0x8] sm:$0xff]  }
 0x105   :  { %1321 = vmatprep.subr.bf16.mxu0 %v1783_v0 }
 0x108   :  { %1322 = vmatpush3.bf16.msra.mxu0 %v1472_v25  ;;  %v1496_v25 = vld [vmem:[#allocation15 + $0x10] sm:$0xff]  }
 0x109   :  { %1323 = vmatprep.subr.bf16.mxu0 %v1783_v0 }
 0x10c   :  { %1324 = vmatpush3.bf16.msra.mxu0 %v1474_v26  ;;  %v1497_v26 = vld [vmem:[#allocation15 + $0x18] sm:$0xff]  }
 0x10d   :  { %1325 = vmatprep.subr.bf16.mxu0 %v1783_v0 }
 0x110   :  { %1326 = vmatpush3.bf16.msra.mxu0 %v1476_v27  ;;  %v1498_v27 = vld [vmem:[#allocation15 + $0x20] sm:$0xff]  }
 0x111   :  { %1351 = vmatprep.subr.bf16.mxu0 %v1783_v0 }
 0x113   :  { %1328 = vmatmul.mubr.bf16.vlgmr.msra.gmra.mrb[4].mxu0 %v448_v47 }
 0x114   :  { %1367 = vmatprep.mubr.msk.bf16.mxu0 %vm1784_vm0, %v1783_v0  ;;  %1352 = vmatpush3.bf16.msra.mxu0 %v1486_v48 }
 0x115   :  { %1353 = vmatprep.subr.bf16.mxu0 %v1783_v0 }
 0x118   :  { %1354 = vmatpush3.bf16.msra.mxu0 %v1487_v49 }
 0x119   :  { %1355 = vmatprep.subr.bf16.mxu0 %v1783_v0 }
 0x11c   :  { %1356 = vmatpush3.bf16.msra.mxu0 %v1488_v50 }
 0x11d   :  { %1357 = vmatprep.subr.bf16.mxu0 %v1783_v0 }
 0x120   :  { %1358 = vmatpush3.bf16.msra.mxu0 %v1489_v51 }
 0x121   :  { %1359 = vmatprep.subr.bf16.mxu0 %v1783_v0 }
 0x124   :  { %1360 = vmatpush3.bf16.msra.mxu0 %v1490_v52 }
 0x125   :  { %1361 = vmatprep.subr.bf16.mxu0 %v1783_v0 }
 0x128   :  { %1362 = vmatpush3.bf16.msra.mxu0 %v1491_v53 }
 0x129   :  { %1363 = vmatprep.subr.bf16.mxu0 %v1783_v0 }
 0x12c   :  { %1364 = vmatpush3.bf16.msra.mxu0 %v1492_v12 }
 0x12d   :  { %1365 = vmatprep.subr.bf16.mxu0 %v1783_v0 }
 0x130   :  { %1366 = vmatpush3.bf16.msra.mxu0 %v1493_v13 }
 0x131   :  { %1391 = vmatprep.subr.bf16.mxu0 %v1783_v0 }
 0x1c6   :  { %v308_v29 = vpop.f32.mrb[0].mxu0 }
 0x1c7   :  { %v309_v30 = vadd.f32 %v1129_v28, %v308_v29  ;;  %v1289_v31 = vpop.f32.mrb[1].mxu0  ;;  %v1500_v29 = vld [vmem:[#allocation15 + $0x30] sm:$0xff]  }
 0x1c8   :  { %v311_v32 = vpop.f32.mrb[2].mxu0 }
 0x1c9   :  { %v312_v33 = vadd.f32 %v1129_v28, %v311_v32  ;;  %v1290_v34 = vpop.f32.mrb[3].mxu0  ;;  %v315_v35 = vmax.f32 %v309_v30, 0.0  ;;  %v1499_v28 = vld [vmem:[#allocation15 + $0x28] sm:$0xff]  }
 0x1cb   :  { %v316_v36 = vmax.f32 %v312_v33, 0.0  ;;  %v1501_v33 = vld [vmem:[#allocation15 + $0x38] sm:$0xff]  }
 0x1cd   :  { %v317_v38 = vpack.c.bf16 %v316_v36, %v315_v35  ;;  %v1502_v35 = vld [vmem:[#allocation18] sm:$0xff]   ;;  %v1503_v36 = vld [vmem:[#allocation18 + $0x8] sm:$0xff]  }
 0x1cf   :  { %1308 = vmatmul.mubr.bf16.vlgmr.msra.gmra.mrb[0].mxu1 %v317_v38  ;;  %v1505_v38 = vld [vmem:[#allocation18 + $0x18] sm:$0xff]  }
 0x1d0   :  { %1332 = vmatpush3.bf16.msra.mxu1 %v1463_v37  ;;  %1347 = vmatprep.mubr.msk.bf16.mxu1 %vm1784_vm0, %v1783_v0  ;;  %v1504_v37 = vld [vmem:[#allocation18 + $0x10] sm:$0xff]  }
 0x1d1   :  { %1333 = vmatprep.subr.bf16.mxu1 %v1783_v0 }
 0x1d4   :  { %1334 = vmatpush3.bf16.msra.mxu1 %v1465_v39  ;;  %v1506_v39 = vld [vmem:[#allocation18 + $0x20] sm:$0xff]  }
 0x1d5   :  { %1335 = vmatprep.subr.bf16.mxu1 %v1783_v0 }
 0x1d8   :  { %1336 = vmatpush3.bf16.msra.mxu1 %v1467_v40  ;;  %v1507_v40 = vld [vmem:[#allocation18 + $0x28] sm:$0xff]  }
 0x1d9   :  { %1337 = vmatprep.subr.bf16.mxu1 %v1783_v0 }
 0x1dc   :  { %1338 = vmatpush3.bf16.msra.mxu1 %v1469_v41  ;;  %v1508_v41 = vld [vmem:[#allocation18 + $0x30] sm:$0xff]  }
 0x1dd   :  { %1339 = vmatprep.subr.bf16.mxu1 %v1783_v0 }
 0x1e0   :  { %1340 = vmatpush3.bf16.msra.mxu1 %v1471_v42  ;;  %v1509_v42 = vld [vmem:[#allocation18 + $0x38] sm:$0xff]  }
 0x1e1   :  { %1341 = vmatprep.subr.bf16.mxu1 %v1783_v0 }
 0x1e4   :  { %1342 = vmatpush3.bf16.msra.mxu1 %v1473_v43  ;;  %v1164_v43 = vld [vmem:[%s2191_s14] ss:$0 sm:$0xff] }
 0x1e5   :  { %1343 = vmatprep.subr.bf16.mxu1 %v1783_v0 }
 0x1e6   :  { %v547_v8 = vpop.f32.mrb[4].mxu0 }
 0x1e7   :  { %v1329_v9 = vpop.f32.mrb[5].mxu0 }
 0x1e8   :  { %1344 = vmatpush3.bf16.msra.mxu1 %v1475_v44  ;;  %v550_v10 = vpop.f32.mrb[6].mxu0 }
 0x1e9   :  { %1345 = vmatprep.subr.bf16.mxu1 %v1783_v0  ;;  %v1330_v11 = vpop.f32.mrb[7].mxu0 }
 0x1ec   :  { %1346 = vmatpush3.bf16.msra.mxu1 %v1477_v45 }
 0x1ed   :  { %1371 = vmatprep.subr.bf16.mxu1 %v1783_v0 }
 0x2a2   :  { %v423_v55 = vpop.f32.mrb[0].mxu1 }
 0x2a3   :  { %v424_v56 = vadd.f32 %v1138_v54, %v423_v55  ;;  %v1309_v57 = vpop.f32.mrb[1].mxu1 }
 0x2a4   :  { %v426_v58 = vpop.f32.mrb[2].mxu1 }
 0x2a5   :  { %v2119_v60 = vpack.c.bf16 %v424_v56, %v424_v56  ;;  %v1310_v61 = vpop.f32.mrb[3].mxu1  ;;  %v2130_v6 = vadd.f32 %v1138_v54, %v426_v58 }
 0x2a7   :  { %1348 = vmatmul.mubr.bf16.vlgmr.msra.gmra.mrb[4].mxu1 %v2119_v60  ;;  %v778_v7 = vpack.c.bf16 %v2130_v6, %v2130_v6 }
 0x2a8   :  { %1372 = vmatpush3.bf16.msra.mxu1 %v1478_v59  ;;  %1387 = vmatprep.mubr.msk.bf16.mxu1 %vm1784_vm0, %v1783_v0 }
 0x2a9   :  { %1373 = vmatprep.subr.bf16.mxu1 %v1783_v0 }
 0x2ac   :  { %1374 = vmatpush3.bf16.msra.mxu1 %v1479_v62 }
 0x2ad   :  { %1375 = vmatprep.subr.bf16.mxu1 %v1783_v0 }
 0x2b0   :  { %1376 = vmatpush3.bf16.msra.mxu1 %v1480_v63 }
 0x2b1   :  { %1377 = vmatprep.subr.bf16.mxu1 %v1783_v0 }
 0x2b4   :  { %1378 = vmatpush3.bf16.msra.mxu1 %v1481_v1 }
 0x2b5   :  { %1379 = vmatprep.subr.bf16.mxu1 %v1783_v0 }
 0x2b8   :  { %1380 = vmatpush3.bf16.msra.mxu1 %v1482_v2 }
 0x2b9   :  { %1381 = vmatprep.subr.bf16.mxu1 %v1783_v0 }
 0x2bc   :  { %1382 = vmatpush3.bf16.msra.mxu1 %v1483_v3  ;;  %v1190_v3 = vld [vmem:[%s2202_s30] ss:$0 sm:$0xff] }
 0x2bd   :  { %1383 = vmatprep.subr.bf16.mxu1 %v1783_v0 }
 0x2c0   :  { %1384 = vmatpush3.bf16.msra.mxu1 %v1484_v4 }
 0x2c1   :  { %1385 = vmatprep.subr.bf16.mxu1 %v1783_v0 }
 0x2c4   :  { %1386 = vmatpush3.bf16.msra.mxu1 %v1485_v5 }
 0x2c5   :  { %1411 = vmatprep.subr.bf16.mxu1 %v1783_v0 }
 0x2c7   :  { %1388 = vmatmul.mubr.bf16.vlgmr.msra.gmra.mrb[8].mxu1 %v778_v7 }
 0x2c8   :  { %1427 = vmatprep.mubr.msk.bf16.mxu1 %vm1784_vm0, %v1783_v0  ;;  %1412 = vmatpush3.bf16.msra.mxu1 %v1502_v35 }
 0x2c9   :  { %1413 = vmatprep.subr.bf16.mxu1 %v1783_v0 }
 0x2cc   :  { %1414 = vmatpush3.bf16.msra.mxu1 %v1503_v36 }
 0x2cd   :  { %1415 = vmatprep.subr.bf16.mxu1 %v1783_v0 }
 0x2d0   :  { %1416 = vmatpush3.bf16.msra.mxu1 %v1504_v37 }
 0x2d1   :  { %1417 = vmatprep.subr.bf16.mxu1 %v1783_v0 }
 0x2d4   :  { %1418 = vmatpush3.bf16.msra.mxu1 %v1505_v38 }
 0x2d5   :  { %1419 = vmatprep.subr.bf16.mxu1 %v1783_v0 }
 0x2d8   :  { %1420 = vmatpush3.bf16.msra.mxu1 %v1506_v39 }
 0x2d9   :  { %1421 = vmatprep.subr.bf16.mxu1 %v1783_v0 }
 0x2dc   :  { %1422 = vmatpush3.bf16.msra.mxu1 %v1507_v40 }
 0x2dd   :  { %1423 = vmatprep.subr.bf16.mxu1 %v1783_v0 }
 0x2e0   :  { %1424 = vmatpush3.bf16.msra.mxu1 %v1508_v41 }
 0x2e1   :  { %1425 = vmatprep.subr.bf16.mxu1 %v1783_v0 }
 0x2e4   :  { %1426 = vmatpush3.bf16.msra.mxu1 %v1509_v42 }
 0x37a   :  { %v635_v14 = vpop.f32.mrb[4].mxu1 }
 0x37b   :  { %v636_v16 = vadd.f32 %v635_v14, %v547_v8  ;;  %v1349_v17 = vpop.f32.mrb[5].mxu1 }
 0x37c   :  { %v638_v18 = vpop.f32.mrb[6].mxu1 }
 0x37d   :  { %v648_v19 = vadd.f32 %v1163_v15, %v636_v16  ;;  %v1350_v20 = vpop.f32.mrb[7].mxu1 }
 0x37f   :  { %v649_v21 = vmax.f32 %v648_v19, 0.0 }
 0x381   :  { %v650_v23 = vpack.c.bf16 %v649_v21, %v649_v21 }
 0x383   :  { %1368 = vmatmul.mubr.bf16.vlgmr.msra.gmra.mrb[8].mxu0 %v650_v23 }
 0x384   :  { %1392 = vmatpush3.bf16.msra.mxu0 %v1494_v22  ;;  %1407 = vmatprep.mubr.msk.bf16.mxu0 %vm1784_vm0, %v1783_v0 }
 0x385   :  { %1393 = vmatprep.subr.bf16.mxu0 %v1783_v0 }
 0x388   :  { %1394 = vmatpush3.bf16.msra.mxu0 %v1495_v24 }
 0x389   :  { %1395 = vmatprep.subr.bf16.mxu0 %v1783_v0 }
 0x38c   :  { %1396 = vmatpush3.bf16.msra.mxu0 %v1496_v25 }
 0x38d   :  { %1397 = vmatprep.subr.bf16.mxu0 %v1783_v0 }
 0x390   :  { %1398 = vmatpush3.bf16.msra.mxu0 %v1497_v26 }
 0x391   :  { %1399 = vmatprep.subr.bf16.mxu0 %v1783_v0 }
 0x394   :  { %1400 = vmatpush3.bf16.msra.mxu0 %v1498_v27 }
 0x395   :  { %1401 = vmatprep.subr.bf16.mxu0 %v1783_v0 }
 0x398   :  { %1402 = vmatpush3.bf16.msra.mxu0 %v1499_v28 }
 0x399   :  { %1403 = vmatprep.subr.bf16.mxu0 %v1783_v0 }
 0x39a   :  { %v877_v30 = vpop.f32.mrb[8].mxu1 }
 0x39b   :  { %v1389_v31 = vpop.f32.mrb[9].mxu1 }
 0x39c   :  { %v880_v32 = vpop.f32.mrb[10].mxu1  ;;  %1404 = vmatpush3.bf16.msra.mxu0 %v1500_v29 }
 0x39d   :  { %v1390_v34 = vpop.f32.mrb[11].mxu1  ;;  %1405 = vmatprep.subr.bf16.mxu0 %v1783_v0  ;;  %v1189_v0 = vld [vmem:[%s2192_s15] ss:$0 sm:$0xff] }
 0x3a0   :  { %1406 = vmatpush3.bf16.msra.mxu0 %v1501_v33 }
 0x3a3   :  { %1408 = vmatmul.mubr.bf16.vlgmr.msra.gmra.mrb[12].mxu0 %v2119_v60 }
 0x456   :  { %v756_v44 = vpop.f32.mrb[8].mxu0 }
 0x457   :  { %v757_v45 = vadd.f32 %v1164_v43, %v756_v44  ;;  %v1369_v47 = vpop.f32.mrb[9].mxu0 }
 0x458   :  { %v759_v48 = vpop.f32.mrb[10].mxu0 }
 0x459   :  { %v1370_v49 = vpop.f32.mrb[11].mxu0  ;;  %v1093_v50 = vsub.f32 %v2130_v6, %v757_v45 }
 0x45b   :  { %v1095_v51 = vmul.f32 %v1093_v50, %v1093_v50 }
 0x45d   :  { %1096 = vadd.xlane.f32.xlu0 %v1095_v51 }
 0x476   :  { %v965_v52 = vpop.f32.mrb[12].mxu0 }
 0x477   :  { %v966_v53 = vadd.f32 %v965_v52, %v877_v30  ;;  %v1409_v54 = vpop.f32.mrb[13].mxu0 }
 0x478   :  { %v968_v55 = vpop.f32.mrb[14].mxu0 }
 0x479   :  { %v978_v56 = vadd.f32 %v1189_v0, %v966_v53  ;;  %v1410_v57 = vpop.f32.mrb[15].mxu0 }
 0x47b   :  { %v979_v58 = vmax.f32 %v978_v56, 0.0 }
 0x47d   :  { %v980_v59 = vpack.c.bf16 %v979_v58, %v979_v58 }
 0x47f   :  { %1428 = vmatmul.mubr.bf16.vlgmr.msra.gmra.mrb[12].mxu1 %v980_v59 }
 0x4ea   :  { %v1097_v60 = vpop.xlane.xlu0 %1096 }
 0x4eb   :  { %1510 = vrsqrt.f32 %v1097_v60  ;;  %vm1100_vm2 = vcmp.eq.f32.partialorder %v1097_v60, inf  ;;  %v1103_v63 = vand.u32 2147483648, %v1097_v60  ;;  %vm1102_vm3 = vcmp.eq.f32.partialorder %v1097_v60, 0.0 }
 0x4f5   :  { %v1511_v61 = vpop.eup %1510 }
 0x4f6   :  { %v1099_v62 = vmul.f32 %v1511_v61, %v1097_v60 }
 0x4f8   :  { %v1101_v1 = vsel %vm1100_vm2, %v1097_v60, %v1099_v62 }
 0x4f9   :  { %v1104_v2 = vsel %vm1102_vm3, %v1103_v63, %v1101_v1 }
 0x4fa   :  { %1106 = vst.msk [vmem:[%s2194_s17] sm:$0xff] %vm1105_vm1, %v1104_v2 }
 0x552   :  { %v1086_v4 = vpop.f32.mrb[12].mxu1 }
 0x553   :  { %v1087_v5 = vadd.f32 %v1190_v3, %v1086_v4  ;;  %v1429_v6 = vpop.f32.mrb[13].mxu1 }
 0x554   :  { %v1089_v7 = vpop.f32.mrb[14].mxu1 }
 0x555   :  { %1512 = vtanh.f32 %v1087_v5  ;;  %v1430_v8 = vpop.f32.mrb[15].mxu1 }
 0x55f   :  { %v1513_v9 = vpop.eup %1512 }
 0x560   :  { %v1094_v10 = vsub.f32 %v2103_v46, %v1513_v9 }
 0x562   :  { %v1107_v11 = vmul.f32 %v1094_v10, %v1094_v10 }
 0x564   :  { %1108 = vadd.xlane.f32.xlu0 %v1107_v11 }
 0x5f1   :  { %v1109_v12 = vpop.xlane.xlu0 %1108 }
 0x5f2   :  { %1514 = vrsqrt.f32 %v1109_v12  ;;  %vm1112_vm5 = vcmp.eq.f32.partialorder %v1109_v12, inf  ;;  %v1115_v15 = vand.u32 2147483648, %v1109_v12  ;;  %vm1114_vm6 = vcmp.eq.f32.partialorder %v1109_v12, 0.0 }
 0x5fc   :  { %v1515_v13 = vpop.eup %1514 }
 0x5fd   :  { %v1111_v14 = vmul.f32 %v1515_v13, %v1109_v12 }
 0x5ff   :  { %v1113_v16 = vsel %vm1112_vm5, %v1109_v12, %v1111_v14 }
 0x600   :  { %v1116_v17 = vsel %vm1114_vm6, %v1115_v15, %v1113_v16 }
 0x601   :  { %1118 = vst.msk [vmem:[%s2194_s17] sm:$0xff] %vm1117_vm4, %v1116_v17 }
 0x602   :  { %1123 = vsyncpa [#allocation3], 1 }
 0x603   :  { %1124 = vsyncpa [#allocation5], 1 }
 0x604   :  { %1125 = vsyncpa [#allocation8], 1 }
 0x605   :  { %1126 = vsyncpa [#allocation11], 1 }
 0x606   :  { %1127 = vsyncpa [#allocation14], 1 }
 0x607   :  { %1128 = vsyncpa [#allocation17], 1 }

</bundles_post_ra>
